<compile_context>
chip_gen: v7x
topology: tpu7x:2x2x1
jax: 0.10.0
libtpu: 0.0.40
codegen_flags: <defaults>
</compile_context>

<pallas_src>
import functools

import jax
import jax.numpy as jnp
from jax import lax
from jax.experimental import pallas as pl
from jax.experimental.pallas import tpu as pltpu


# ------------------------------- fused kernel ------------------------------- #

def _fused_ir_kernel(*refs, stride, th_out, w_out, expand, use_res):
    """One grid step = (batch b, output-row tile j).

    refs (expand=True):  x, w1, b1, wdw, b2, w2, b3, out, h1pad_scratch
    refs (expand=False): x,         wdw, b2, w2, b3, out, h1pad_scratch

    x      : (1, H, W, Cin)        full input image (resident across j)
    w1     : (Cin, hidden)         1x1 expand weights, BN1 scale folded in
    b1     : (1, hidden)           BN1 shift
    wdw    : (9, hidden)           3x3 depthwise taps (dy*3+dx), BN2 scale folded in
    b2     : (1, hidden)           BN2 shift
    w2     : (hidden, Cout)        1x1 project weights, BN3 scale folded in
    b3     : (1, Cout)             BN3 shift
    out    : (1, th_out, W_out, Cout)  output row tile
    h1pad  : (H+2, W+2, hidden)    zero-padded expanded activation (VMEM scratch)
    """
    if expand:
        (x_ref, w1_ref, b1_ref, wdw_ref, b2_ref, w2_ref, b3_ref,
         o_ref, h1pad_ref) = refs
    else:
        (x_ref, wdw_ref, b2_ref, w2_ref, b3_ref, o_ref, h1pad_ref) = refs
        w1_ref = b1_ref = None

    _, h, w, cin = x_ref.shape
    hidden = h1pad_ref.shape[-1]
    oup = o_ref.shape[-1]
    s = stride
    j = pl.program_id(1)

    # ---- Stage 1 (once per image): expand 1x1 + BN + ReLU6 into padded scratch.
    @pl.when(j == 0)
    def _():
        zrow = jnp.zeros((1, w + 2, hidden), jnp.float32)
        h1pad_ref[0:1, :, :] = zrow                 # top halo row
        h1pad_ref[h + 1:h + 2, :, :] = zrow         # bottom halo row
        x = x_ref[0]                                # (H, W, Cin)
        if expand:
            h1 = jnp.dot(x.reshape(h * w, cin), w1_ref[...],
                         preferred_element_type=jnp.float32)
            h1 = jnp.clip(h1 + b1_ref[...], 0.0, 6.0).reshape(h, w, hidden)
        else:
            h1 = x                                  # expand_ratio == 1: hidden == Cin
        zcol = jnp.zeros((h, 1, hidden), jnp.float32)
        # Column halo built in VMEM; row-offset store is tile-aligned.
        h1pad_ref[1:h + 1, :, :] = jnp.concatenate([zcol, h1, zcol], axis=1)

    # ---- Stage 2: depthwise 3x3 + BN shift + ReLU6 on this output-row tile.
    th_in = (th_out - 1) * s + 3                    # input rows incl. halo
    row0 = pl.multiple_of(j * th_out * s, th_out * s)
    win = h1pad_ref[pl.ds(row0, th_in), :, :]       # (th_in, W+2, hidden)
    row_span = (th_out - 1) * s + 1
    col_span = (w_out - 1) * s + 1
    acc = jnp.zeros((th_out, w_out, hidden), jnp.float32)
    # NOTE: for stride=2 these tap slices are sublane-strided (correct, a bit
    # repack-heavy); the test harness exercises the stride=1 variants.
    for dy in range(3):
        for dx in range(3):
            tap = win[dy:dy + row_span:s, dx:dx + col_span:s, :]
            acc = acc + tap * wdw_ref[dy * 3 + dx, :].reshape(1, 1, hidden)
    h2 = jnp.clip(acc + b2_ref[...], 0.0, 6.0)

    # ---- Stage 3: project 1x1 + BN shift (+ residual from the resident x tile).
    y = jnp.dot(h2.reshape(th_out * w_out, hidden), w2_ref[...],
                preferred_element_type=jnp.float32)
    y = y + b3_ref[...]
    if use_res:  # stride == 1 and Cin == Cout: reuse the x block already in VMEM
        xres = x_ref[0, pl.ds(row0, th_out), :, :]  # (th_out, W, Cin)
        y = y + xres.reshape(th_out * w_out, oup)
    o_ref[...] = y.reshape(1, th_out, w_out, oup).astype(o_ref.dtype)


# ------------------------------- call wrapper ------------------------------- #

def _largest_divisor_leq(n, cap):
    for d in range(min(cap, n), 0, -1):
        if n % d == 0:
            return d
    return 1


def inverted_residual_forward(x_nchw, params, *, inp, oup, stride, expand_ratio,
                              row_tile=8):
    """Forward pass matching PyTorch InvertedResidual (BatchNorm in eval mode)."""
    assert stride in (1, 2)
    hidden = int(inp * expand_ratio)
    expand = expand_ratio != 1
    use_res = (stride == 1) and (inp == oup)

    # NCHW -> NHWC (channels on the lane axis). In a full NHWC network these
    # transposes would be dropped.
    x = jnp.transpose(x_nchw, (0, 2, 3, 1)).astype(jnp.float32)
    n, h, w, cin = x.shape
    assert cin == inp
    h_out = (h + 2 - 3) // stride + 1
    w_out = (w + 2 - 3) // stride + 1

    # Output-row tile: largest divisor of h_out <= row_tile (exact grid; ~8-16
    # rows gives many pipeline steps and a few-hundred-KB working set at real sizes).
    th_out = _largest_divisor_leq(h_out, row_tile)
    n_row_tiles = h_out // th_out

    # Fold BN scales into conv weights (eval-mode BN); keep only the shifts.
    wdw = (params["wdw"] * params["s2"]).astype(jnp.float32)    # (9, hidden)
    w2 = (params["w2"] * params["s3"]).astype(jnp.float32)      # (hidden, oup)
    b2, b3 = params["b2"], params["b3"]

    kernel = functools.partial(_fused_ir_kernel, stride=stride, th_out=th_out,
                               w_out=w_out, expand=expand, use_res=use_res)

    def rep(shape):  # grid-invariant (replicated) operand, fetched once
        return pl.BlockSpec(shape, lambda b, j: (0,) * len(shape))

    x_spec = pl.BlockSpec((1, h, w, cin), lambda b, j: (b, 0, 0, 0))
    out_spec = pl.BlockSpec((1, th_out, w_out, oup), lambda b, j: (b, j, 0, 0))

    if expand:
        w1 = (params["w1"] * params["s1"]).astype(jnp.float32)  # (cin, hidden)
        b1 = params["b1"]
        in_specs = [x_spec, rep((cin, hidden)), rep((1, hidden)),
                    rep((9, hidden)), rep((1, hidden)),
                    rep((hidden, oup)), rep((1, oup))]
        args = (x, w1, b1, wdw, b2, w2, b3)
    else:
        in_specs = [x_spec, rep((9, hidden)), rep((1, hidden)),
                    rep((hidden, oup)), rep((1, oup))]
        args = (x, wdw, b2, w2, b3)

    out = pl.pallas_call(
        kernel,
        out_shape=jax.ShapeDtypeStruct((n, h_out, w_out, oup), jnp.float32),
        grid=(n, n_row_tiles),
        in_specs=in_specs,
        out_specs=out_spec,
        scratch_shapes=[pltpu.VMEM((h + 2, w + 2, hidden), jnp.float32)],
        compiler_params=pltpu.CompilerParams(
            # Batch axis may be split across cores; the row-tile axis carries the
            # per-image scratch dependency, so keep it "arbitrary".
            dimension_semantics=("parallel", "arbitrary")),
    )(*args)

    return jnp.transpose(out, (0, 3, 1, 2))  # back to NCHW


# --------------------------- parameters (eval-mode BN) ----------------------- #

def _fold_bn(keys, c):
    """Deterministic BN params folded to per-channel scale/shift (eval mode)."""
    kg, kb, km, kv = keys
    gamma = jax.random.uniform(kg, (c,), minval=0.5, maxval=1.5)
    beta = jax.random.uniform(kb, (c,), minval=-0.1, maxval=0.1)
    mean = jax.random.normal(km, (c,)) * 0.1
    var = jax.random.uniform(kv, (c,), minval=0.5, maxval=1.5)
    scale = gamma / jnp.sqrt(var + 1e-5)
    shift = beta - mean * scale
    return (scale.reshape(1, c).astype(jnp.float32),
            shift.reshape(1, c).astype(jnp.float32))


def make_inverted_residual_params(key, inp, oup, expand_ratio):
    hidden = int(inp * expand_ratio)
    ks = jax.random.split(key, 15)
    p = {}
    if expand_ratio != 1:
        p["w1"] = (jax.random.normal(ks[0], (inp, hidden)) * 0.1).astype(jnp.float32)
        p["s1"], p["b1"] = _fold_bn(ks[1:5], hidden)
    p["wdw"] = (jax.random.normal(ks[5], (9, hidden)) * 0.1).astype(jnp.float32)
    p["s2"], p["b2"] = _fold_bn(ks[6:10], hidden)
    p["w2"] = (jax.random.normal(ks[10], (hidden, oup)) * 0.1).astype(jnp.float32)
    p["s3"], p["b3"] = _fold_bn(ks[11:15], oup)
    return p


# ------------------------------ pure-JAX reference --------------------------- #

def reference_forward(x_nchw, p, *, inp, oup, stride, expand_ratio):
    use_res = (stride == 1) and (inp == oup)
    x = jnp.transpose(x_nchw, (0, 2, 3, 1)).astype(jnp.float32)
    h = x
    if expand_ratio != 1:
        h = jnp.clip(jnp.einsum("nhwc,cd->nhwd", x, p["w1"]) * p["s1"][0]
                     + p["b1"][0], 0.0, 6.0)
    c = h.shape[-1]
    wdw = p["wdw"].reshape(3, 3, c)[:, :, None, :]  # HWIO, grouped
    h = lax.conv_general_dilated(
        h, wdw, (stride, stride), [(1, 1), (1, 1)],
        dimension_numbers=("NHWC", "HWIO", "NHWC"), feature_group_count=c)
    h = jnp.clip(h * p["s2"][0] + p["b2"][0], 0.0, 6.0)
    y = jnp.einsum("nhwc,cd->nhwd", h, p["w2"]) * p["s3"][0] + p["b3"][0]
    if use_res:
        y = y + x
    return jnp.transpose(y, (0, 3, 1, 2))


# ----------------------------------- main ----------------------------------- #

if __name__ == "__main__":
    key = jax.random.PRNGKey(0)

    # (inp, oup, stride, expand_ratio, N, H, W)
    configs = [
        (8, 8, 1, 2, 2, 16, 16),    # expand path + residual (use_res_connect=True)
        (8, 16, 1, 1, 2, 16, 16),   # expand_ratio == 1 path, no residual
    ]

    for inp, oup, stride, expand_ratio, n, hh, ww in configs:
        key, kx, kp = jax.random.split(key, 3)
        x = jax.random.normal(kx, (n, inp, hh, ww), dtype=jnp.float32)  # NCHW
        params = make_inverted_residual_params(kp, inp, oup, expand_ratio)

        out = inverted_residual_forward(
            x, params, inp=inp, oup=oup, stride=stride, expand_ratio=expand_ratio)
        out = jax.block_until_ready(out)

        ref = reference_forward(
            x, params, inp=inp, oup=oup, stride=stride, expand_ratio=expand_ratio)
        assert out.shape == ref.shape
        assert jnp.allclose(out, ref, rtol=1e-4, atol=1e-4), (
            f"mismatch vs reference for config {(inp, oup, stride, expand_ratio)}")

    print("KERNEL_OK")
</pallas_src>

<mosaic_0001>
module attributes {stable_mosaic.version = 11 : i64} {
  func.func @_fused_ir_kernel(%arg0: i32, %arg1: i32, %arg2: memref<1x16x16x8xf32, #tpu.memory_space<vmem>>, %arg3: memref<8x16xf32, #tpu.memory_space<vmem>>, %arg4: memref<1x16xf32, #tpu.memory_space<vmem>>, %arg5: memref<9x16xf32, #tpu.memory_space<vmem>>, %arg6: memref<1x16xf32, #tpu.memory_space<vmem>>, %arg7: memref<16x8xf32, #tpu.memory_space<vmem>>, %arg8: memref<1x8xf32, #tpu.memory_space<vmem>>, %arg9: memref<1x8x16x8xf32, #tpu.memory_space<vmem>>, %arg10: memref<18x18x16xf32, #tpu.memory_space<vmem>>) attributes {dimension_semantics = [#tpu.dimension_semantics<parallel>, #tpu.dimension_semantics<arbitrary>], iteration_bounds = array<i64: 2, 2>, scalar_prefetch = 0 : i64, scratch_operands = 1 : i64, tpu.core_type = #tpu.core_type<tc>, window_params = [{transform_indices = @transform_0, window_bounds = array<i64: 1, 16, 16, 8>}, {pipeline_mode = #tpu.pipeline_mode<synchronous>, transform_indices = @transform_1, window_bounds = array<i64: 8, 16>}, {pipeline_mode = #tpu.pipeline_mode<synchronous>, transform_indices = @transform_2, window_bounds = array<i64: 1, 16>}, {pipeline_mode = #tpu.pipeline_mode<synchronous>, transform_indices = @transform_3, window_bounds = array<i64: 9, 16>}, {pipeline_mode = #tpu.pipeline_mode<synchronous>, transform_indices = @transform_4, window_bounds = array<i64: 1, 16>}, {pipeline_mode = #tpu.pipeline_mode<synchronous>, transform_indices = @transform_5, window_bounds = array<i64: 16, 8>}, {pipeline_mode = #tpu.pipeline_mode<synchronous>, transform_indices = @transform_6, window_bounds = array<i64: 1, 8>}, {transform_indices = @transform_7, window_bounds = array<i64: 1, 8, 16, 8>}]} {
    %c0_i32 = arith.constant 0 : i32
    %0 = arith.cmpi eq, %arg1, %c0_i32 : i32
    %1 = arith.extui %0 : i1 to i32
    %c0_i32_0 = arith.constant 0 : i32
    %2 = arith.cmpi ne, %1, %c0_i32_0 : i32
    scf.if %2 {
      %cst_28 = arith.constant 0.000000e+00 : f32
      %93 = vector.broadcast %cst_28 : f32 to vector<1x18x16xf32>
      %c0_29 = arith.constant 0 : index
      %c0_30 = arith.constant 0 : index
      %c0_31 = arith.constant 0 : index
      %94 = vector.load %arg10[%c0_29, %c0_30, %c0_31] : memref<18x18x16xf32, #tpu.memory_space<vmem>>, vector<1x18x16xf32>
      tpu.vector_store %arg10[%c0_29, %c0_30, %c0_31], %93 {strides = array<i32>} : memref<18x18x16xf32, #tpu.memory_space<vmem>>, vector<1x18x16xf32>,
      %c17 = arith.constant 17 : index
      %c0_32 = arith.constant 0 : index
      %c0_33 = arith.constant 0 : index
      %95 = vector.load %arg10[%c17, %c0_32, %c0_33] : memref<18x18x16xf32, #tpu.memory_space<vmem>>, vector<1x18x16xf32>
      tpu.vector_store %arg10[%c17, %c0_32, %c0_33], %93 {strides = array<i32>} : memref<18x18x16xf32, #tpu.memory_space<vmem>>, vector<1x18x16xf32>,
      %c0_34 = arith.constant 0 : index
      %c0_35 = arith.constant 0 : index
      %c0_36 = arith.constant 0 : index
      %c0_37 = arith.constant 0 : index
      %96 = vector.load %arg2[%c0_34, %c0_35, %c0_36, %c0_37] : memref<1x16x16x8xf32, #tpu.memory_space<vmem>>, vector<1x16x16x8xf32>
      %97 = vector.shape_cast %96 : vector<1x16x16x8xf32> to vector<16x16x8xf32>
      %98 = vector.shape_cast %97 : vector<16x16x8xf32> to vector<256x8xf32>
      %c0_38 = arith.constant 0 : index
      %c0_39 = arith.constant 0 : index
      %99 = vector.load %arg3[%c0_38, %c0_39] : memref<8x16xf32, #tpu.memory_space<vmem>>, vector<8x16xf32>
      %cst_40 = arith.constant dense<0.000000e+00> : vector<256x16xf32>
      %100 = tpu.matmul %98, %99, %cst_40 {dimension_numbers = #tpu.dot_dimension_numbers<[1], [0], [0], [1], [0, 0, 1, 1], [], []>} : vector<256x8xf32>, vector<8x16xf32>, vector<256x16xf32> -> vector<256x16xf32>
      %c0_41 = arith.constant 0 : index
      %c0_42 = arith.constant 0 : index
      %101 = vector.load %arg4[%c0_41, %c0_42] : memref<1x16xf32, #tpu.memory_space<vmem>>, vector<1x16xf32>
      %102 = vector.broadcast %101 : vector<1x16xf32> to vector<256x16xf32>
      %103 = arith.addf %100, %102 : vector<256x16xf32>
      %cst_43 = arith.constant 0.000000e+00 : f32
      %cst_44 = arith.constant 6.000000e+00 : f32
      %104 = vector.broadcast %cst_43 : f32 to vector<256x16xf32>
      %105 = arith.maximumf %104, %103 : vector<256x16xf32>
      %106 = vector.broadcast %cst_44 : f32 to vector<256x16xf32>
      %107 = arith.minimumf %106, %105 : vector<256x16xf32>
      %108 = vector.shape_cast %107 : vector<256x16xf32> to vector<16x16x16xf32>
      %cst_45 = arith.constant 0.000000e+00 : f32
      %109 = vector.broadcast %cst_45 : f32 to vector<16x1x16xf32>
      %110 = tpu.concatenate %109, %108, %109 in 1 : vector<16x1x16xf32>, vector<16x16x16xf32>, vector<16x1x16xf32> -> vector<16x18x16xf32>
      %c1_46 = arith.constant 1 : index
      %c0_47 = arith.constant 0 : index
      %c0_48 = arith.constant 0 : index
      %111 = vector.load %arg10[%c1_46, %c0_47, %c0_48] : memref<18x18x16xf32, #tpu.memory_space<vmem>>, vector<16x18x16xf32>
      tpu.vector_store %arg10[%c1_46, %c0_47, %c0_48], %110 {strides = array<i32>} : memref<18x18x16xf32, #tpu.memory_space<vmem>>, vector<16x18x16xf32>,
    } else {
    }
    %c8_i32 = arith.constant 8 : i32
    %3 = arith.muli %arg1, %c8_i32 : i32
    %c1_i32 = arith.constant 1 : i32
    %4 = arith.muli %3, %c1_i32 : i32
    %5 = tpu.assume_multiple %4, 8 : i32
    %6 = arith.index_cast %5 : i32 to index
    %c0 = arith.constant 0 : index
    %c0_1 = arith.constant 0 : index
    %7 = vector.load %arg10[%6, %c0, %c0_1] : memref<18x18x16xf32, #tpu.memory_space<vmem>>, vector<10x18x16xf32>
    %cst = arith.constant 0.000000e+00 : f32
    %8 = vector.broadcast %cst : f32 to vector<8x16x16xf32>
    %9 = vector.extract_strided_slice %7 {offsets = [0, 0, 0], sizes = [8, 16, 16], strides = [1, 1, 1]} : vector<10x18x16xf32> to vector<8x16x16xf32>
    %c0_2 = arith.constant 0 : index
    %c0_3 = arith.constant 0 : index
    %10 = vector.load %arg5[%c0_2, %c0_3] : memref<9x16xf32, #tpu.memory_space<vmem>>, vector<1x16xf32>
    %11 = vector.shape_cast %10 : vector<1x16xf32> to vector<16xf32>
    %12 = vector.shape_cast %11 : vector<16xf32> to vector<1x1x16xf32>
    %13 = vector.broadcast %12 : vector<1x1x16xf32> to vector<8x16x16xf32>
    %14 = arith.mulf %9, %13 : vector<8x16x16xf32>
    %15 = arith.addf %8, %14 : vector<8x16x16xf32>
    %16 = vector.extract_strided_slice %7 {offsets = [0, 1, 0], sizes = [8, 16, 16], strides = [1, 1, 1]} : vector<10x18x16xf32> to vector<8x16x16xf32>
    %c1 = arith.constant 1 : index
    %c0_4 = arith.constant 0 : index
    %17 = vector.load %arg5[%c1, %c0_4] : memref<9x16xf32, #tpu.memory_space<vmem>>, vector<1x16xf32>
    %18 = vector.shape_cast %17 : vector<1x16xf32> to vector<16xf32>
    %19 = vector.shape_cast %18 : vector<16xf32> to vector<1x1x16xf32>
    %20 = vector.broadcast %19 : vector<1x1x16xf32> to vector<8x16x16xf32>
    %21 = arith.mulf %16, %20 : vector<8x16x16xf32>
    %22 = arith.addf %15, %21 : vector<8x16x16xf32>
    %23 = vector.extract_strided_slice %7 {offsets = [0, 2, 0], sizes = [8, 16, 16], strides = [1, 1, 1]} : vector<10x18x16xf32> to vector<8x16x16xf32>
    %c2 = arith.constant 2 : index
    %c0_5 = arith.constant 0 : index
    %24 = vector.load %arg5[%c2, %c0_5] : memref<9x16xf32, #tpu.memory_space<vmem>>, vector<1x16xf32>
    %25 = vector.shape_cast %24 : vector<1x16xf32> to vector<16xf32>
    %26 = vector.shape_cast %25 : vector<16xf32> to vector<1x1x16xf32>
    %27 = vector.broadcast %26 : vector<1x1x16xf32> to vector<8x16x16xf32>
    %28 = arith.mulf %23, %27 : vector<8x16x16xf32>
    %29 = arith.addf %22, %28 : vector<8x16x16xf32>
    %30 = vector.extract_strided_slice %7 {offsets = [1, 0, 0], sizes = [8, 16, 16], strides = [1, 1, 1]} : vector<10x18x16xf32> to vector<8x16x16xf32>
    %c3 = arith.constant 3 : index
    %c0_6 = arith.constant 0 : index
    %31 = vector.load %arg5[%c3, %c0_6] : memref<9x16xf32, #tpu.memory_space<vmem>>, vector<1x16xf32>
    %32 = vector.shape_cast %31 : vector<1x16xf32> to vector<16xf32>
    %33 = vector.shape_cast %32 : vector<16xf32> to vector<1x1x16xf32>
    %34 = vector.broadcast %33 : vector<1x1x16xf32> to vector<8x16x16xf32>
    %35 = arith.mulf %30, %34 : vector<8x16x16xf32>
    %36 = arith.addf %29, %35 : vector<8x16x16xf32>
    %37 = vector.extract_strided_slice %7 {offsets = [1, 1, 0], sizes = [8, 16, 16], strides = [1, 1, 1]} : vector<10x18x16xf32> to vector<8x16x16xf32>
    %c4 = arith.constant 4 : index
    %c0_7 = arith.constant 0 : index
    %38 = vector.load %arg5[%c4, %c0_7] : memref<9x16xf32, #tpu.memory_space<vmem>>, vector<1x16xf32>
    %39 = vector.shape_cast %38 : vector<1x16xf32> to vector<16xf32>
    %40 = vector.shape_cast %39 : vector<16xf32> to vector<1x1x16xf32>
    %41 = vector.broadcast %40 : vector<1x1x16xf32> to vector<8x16x16xf32>
    %42 = arith.mulf %37, %41 : vector<8x16x16xf32>
    %43 = arith.addf %36, %42 : vector<8x16x16xf32>
    %44 = vector.extract_strided_slice %7 {offsets = [1, 2, 0], sizes = [8, 16, 16], strides = [1, 1, 1]} : vector<10x18x16xf32> to vector<8x16x16xf32>
    %c5 = arith.constant 5 : index
    %c0_8 = arith.constant 0 : index
    %45 = vector.load %arg5[%c5, %c0_8] : memref<9x16xf32, #tpu.memory_space<vmem>>, vector<1x16xf32>
    %46 = vector.shape_cast %45 : vector<1x16xf32> to vector<16xf32>
    %47 = vector.shape_cast %46 : vector<16xf32> to vector<1x1x16xf32>
    %48 = vector.broadcast %47 : vector<1x1x16xf32> to vector<8x16x16xf32>
    %49 = arith.mulf %44, %48 : vector<8x16x16xf32>
    %50 = arith.addf %43, %49 : vector<8x16x16xf32>
    %51 = vector.extract_strided_slice %7 {offsets = [2, 0, 0], sizes = [8, 16, 16], strides = [1, 1, 1]} : vector<10x18x16xf32> to vector<8x16x16xf32>
    %c6 = arith.constant 6 : index
    %c0_9 = arith.constant 0 : index
    %52 = vector.load %arg5[%c6, %c0_9] : memref<9x16xf32, #tpu.memory_space<vmem>>, vector<1x16xf32>
    %53 = vector.shape_cast %52 : vector<1x16xf32> to vector<16xf32>
    %54 = vector.shape_cast %53 : vector<16xf32> to vector<1x1x16xf32>
    %55 = vector.broadcast %54 : vector<1x1x16xf32> to vector<8x16x16xf32>
    %56 = arith.mulf %51, %55 : vector<8x16x16xf32>
    %57 = arith.addf %50, %56 : vector<8x16x16xf32>
    %58 = vector.extract_strided_slice %7 {offsets = [2, 1, 0], sizes = [8, 16, 16], strides = [1, 1, 1]} : vector<10x18x16xf32> to vector<8x16x16xf32>
    %c7 = arith.constant 7 : index
    %c0_10 = arith.constant 0 : index
    %59 = vector.load %arg5[%c7, %c0_10] : memref<9x16xf32, #tpu.memory_space<vmem>>, vector<1x16xf32>
    %60 = vector.shape_cast %59 : vector<1x16xf32> to vector<16xf32>
    %61 = vector.shape_cast %60 : vector<16xf32> to vector<1x1x16xf32>
    %62 = vector.broadcast %61 : vector<1x1x16xf32> to vector<8x16x16xf32>
    %63 = arith.mulf %58, %62 : vector<8x16x16xf32>
    %64 = arith.addf %57, %63 : vector<8x16x16xf32>
    %65 = vector.extract_strided_slice %7 {offsets = [2, 2, 0], sizes = [8, 16, 16], strides = [1, 1, 1]} : vector<10x18x16xf32> to vector<8x16x16xf32>
    %c8 = arith.constant 8 : index
    %c0_11 = arith.constant 0 : index
    %66 = vector.load %arg5[%c8, %c0_11] : memref<9x16xf32, #tpu.memory_space<vmem>>, vector<1x16xf32>
    %67 = vector.shape_cast %66 : vector<1x16xf32> to vector<16xf32>
    %68 = vector.shape_cast %67 : vector<16xf32> to vector<1x1x16xf32>
    %69 = vector.broadcast %68 : vector<1x1x16xf32> to vector<8x16x16xf32>
    %70 = arith.mulf %65, %69 : vector<8x16x16xf32>
    %71 = arith.addf %64, %70 : vector<8x16x16xf32>
    %c0_12 = arith.constant 0 : index
    %c0_13 = arith.constant 0 : index
    %72 = vector.load %arg6[%c0_12, %c0_13] : memref<1x16xf32, #tpu.memory_space<vmem>>, vector<1x16xf32>
    %73 = vector.shape_cast %72 : vector<1x16xf32> to vector<1x1x16xf32>
    %74 = vector.broadcast %73 : vector<1x1x16xf32> to vector<8x16x16xf32>
    %75 = arith.addf %71, %74 : vector<8x16x16xf32>
    %cst_14 = arith.constant 0.000000e+00 : f32
    %cst_15 = arith.constant 6.000000e+00 : f32
    %76 = vector.broadcast %cst_14 : f32 to vector<8x16x16xf32>
    %77 = arith.maximumf %76, %75 : vector<8x16x16xf32>
    %78 = vector.broadcast %cst_15 : f32 to vector<8x16x16xf32>
    %79 = arith.minimumf %78, %77 : vector<8x16x16xf32>
    %80 = vector.shape_cast %79 : vector<8x16x16xf32> to vector<128x16xf32>
    %c0_16 = arith.constant 0 : index
    %c0_17 = arith.constant 0 : index
    %81 = vector.load %arg7[%c0_16, %c0_17] : memref<16x8xf32, #tpu.memory_space<vmem>>, vector<16x8xf32>
    %cst_18 = arith.constant dense<0.000000e+00> : vector<128x8xf32>
    %82 = tpu.matmul %80, %81, %cst_18 {dimension_numbers = #tpu.dot_dimension_numbers<[1], [0], [0], [1], [0, 0, 1, 1], [], []>} : vector<128x16xf32>, vector<16x8xf32>, vector<128x8xf32> -> vector<128x8xf32>
    %c0_19 = arith.constant 0 : index
    %c0_20 = arith.constant 0 : index
    %83 = vector.load %arg8[%c0_19, %c0_20] : memref<1x8xf32, #tpu.memory_space<vmem>>, vector<1x8xf32>
    %84 = vector.broadcast %83 : vector<1x8xf32> to vector<128x8xf32>
    %85 = arith.addf %82, %84 : vector<128x8xf32>
    %c0_21 = arith.constant 0 : index
    %86 = arith.index_cast %5 : i32 to index
    %c0_22 = arith.constant 0 : index
    %c0_23 = arith.constant 0 : index
    %87 = vector.load %arg2[%c0_21, %86, %c0_22, %c0_23] : memref<1x16x16x8xf32, #tpu.memory_space<vmem>>, vector<1x8x16x8xf32>
    %88 = vector.shape_cast %87 : vector<1x8x16x8xf32> to vector<8x16x8xf32>
    %89 = vector.shape_cast %88 : vector<8x16x8xf32> to vector<128x8xf32>
    %90 = arith.addf %85, %89 : vector<128x8xf32>
    %91 = vector.shape_cast %90 : vector<128x8xf32> to vector<1x8x16x8xf32>
    %c0_24 = arith.constant 0 : index
    %c0_25 = arith.constant 0 : index
    %c0_26 = arith.constant 0 : index
    %c0_27 = arith.constant 0 : index
    %92 = vector.load %arg9[%c0_24, %c0_25, %c0_26, %c0_27] : memref<1x8x16x8xf32, #tpu.memory_space<vmem>>, vector<1x8x16x8xf32>
    tpu.vector_store %arg9[%c0_24, %c0_25, %c0_26, %c0_27], %91 {strides = array<i32>} : memref<1x8x16x8xf32, #tpu.memory_space<vmem>>, vector<1x8x16x8xf32>,
    return
  }
  func.func @transform_0(%arg0: i32, %arg1: i32) -> (i32, i32, i32, i32) {
    %c0_i32 = arith.constant 0 : i32
    %c0_i32_0 = arith.constant 0 : i32
    %c0_i32_1 = arith.constant 0 : i32
    %c0_i32_2 = arith.constant 0 : i32
    return %arg0, %c0_i32, %c0_i32_0, %c0_i32_1 : i32, i32, i32, i32
  }
  func.func @transform_1(%arg0: i32, %arg1: i32) -> (i32, i32) {
    %c0_i32 = arith.constant 0 : i32
    %c0_i32_0 = arith.constant 0 : i32
    %c0_i32_1 = arith.constant 0 : i32
    return %c0_i32, %c0_i32_0 : i32, i32
  }
  func.func @transform_2(%arg0: i32, %arg1: i32) -> (i32, i32) {
    %c0_i32 = arith.constant 0 : i32
    %c0_i32_0 = arith.constant 0 : i32
    %c0_i32_1 = arith.constant 0 : i32
    return %c0_i32, %c0_i32_0 : i32, i32
  }
  func.func @transform_3(%arg0: i32, %arg1: i32) -> (i32, i32) {
    %c0_i32 = arith.constant 0 : i32
    %c0_i32_0 = arith.constant 0 : i32
    %c0_i32_1 = arith.constant 0 : i32
    return %c0_i32, %c0_i32_0 : i32, i32
  }
  func.func @transform_4(%arg0: i32, %arg1: i32) -> (i32, i32) {
    %c0_i32 = arith.constant 0 : i32
    %c0_i32_0 = arith.constant 0 : i32
    %c0_i32_1 = arith.constant 0 : i32
    return %c0_i32, %c0_i32_0 : i32, i32
  }
  func.func @transform_5(%arg0: i32, %arg1: i32) -> (i32, i32) {
    %c0_i32 = arith.constant 0 : i32
    %c0_i32_0 = arith.constant 0 : i32
    %c0_i32_1 = arith.constant 0 : i32
    return %c0_i32, %c0_i32_0 : i32, i32
  }
  func.func @transform_6(%arg0: i32, %arg1: i32) -> (i32, i32) {
    %c0_i32 = arith.constant 0 : i32
    %c0_i32_0 = arith.constant 0 : i32
    %c0_i32_1 = arith.constant 0 : i32
    return %c0_i32, %c0_i32_0 : i32, i32
  }
  func.func @transform_7(%arg0: i32, %arg1: i32) -> (i32, i32, i32, i32) {
    %c0_i32 = arith.constant 0 : i32
    %c0_i32_0 = arith.constant 0 : i32
    %c0_i32_1 = arith.constant 0 : i32
    return %arg0, %arg1, %c0_i32, %c0_i32_0 : i32, i32, i32, i32
  }
}

</mosaic_0001>

<bundles_post_ra>
// kernel: tpu_custom_call.1
= control target key start
LH: loop header
LB: loop body
LE: loop exit
PB: predicated region body
PF: predicated region fallthrough
CT: control target
= control target key end

     0   :  { %s2602_s24 = smov 0   ;;  %s2604_s25 = smov 0   ;;  %s3964_s0 = inlined_call_operand.vmem [shape: f32[2,16,16,8], index: 0, kind: input, shape index: {}]   ;;  %s3965_s1 = inlined_call_operand.vmem [shape: f32[8,16], index: 1, kind: input, shape index: {}]   ;;  %s3966_s2 = inlined_call_operand.vmem [shape: f32[1,16], index: 2, kind: input, shape index: {}]   ;;  %s3967_s3 = inlined_call_operand.vmem [shape: f32[9,16], index: 3, kind: input, shape index: {}]   ;;  %s3968_s4 = inlined_call_operand.vmem [shape: f32[1,16], index: 4, kind: input, shape index: {}]   ;;  %s3969_s5 = inlined_call_operand.vmem [shape: f32[16,8], index: 5, kind: input, shape index: {}]   ;;  %s3970_s6 = inlined_call_operand.vmem [shape: f32[1,8], index: 6, kind: input, shape index: {}]   ;;  %s3971_s7 = inlined_call_operand.vmem [shape: f32[2,16,16,8], index: 7, kind: output, shape index: {}]  }
   0x1   :  { %s2606_s26 = smov 0   ;;  %s2608_s27 = smov 0  }
   0x2   :  { %s2610_s28 = smov 0  }
   0x3 LB: > { %s26_s29 = sadd.s32 1, %s2551_s26  ;;  %s29_s30 = sadd.s32 1, %s2555_s27  ;;  %s2559_s28 = sphi %s2610_s28, %s17_s28   ;;  %s2555_s27 = sphi %s2608_s27, %s4011_s27   ;;  %s2551_s26 = sphi %s2606_s26, %s4010_s26   ;;  %s2547_s25 = sphi %s2604_s25, %s4009_s25   ;;  %s2543_s24 = sphi %s2602_s24, %s4008_s24  }
   0x4   : > { %p27_p0 = scmp.ge.s32.totalorder %s26_s29, 2  ;;  %p2256_p1 = scmp.ge.s32.totalorder %s2559_s28, 1 }
   0x5   : > { %p251_p2 = scmp.lt.s32.totalorder %s2559_s28, 5 }
   0x6   : > { %s4013_s29 = smov (%p27_p0, %s26_s29), 0  ;;  %s4015_s30 = smov (!%p27_p0, %s29_s30), %s2555_s27 }
   0x7   : > { %p252_p3 = pnand %p2256_p1, %p251_p2  ;;  %p31_p4 = scmp.ge.s32.totalorder %s4015_s30, 2 }
   0x8   : > { %p288_p5 = scmp.lt.s32.totalorder (!%p252_p3), %s2547_s25, 1  ;;  %s2259_s8 = sshll.u32 (!%p252_p3), %s2543_s24, 3 }
   0x9   : > { %s4017_s30 = smov (%p31_p4, %s4015_s30), 0  ;;  %255 = sbr.rel (%p252_p3) target bundleno = 679 (0x2a7), region = 48 }
   0xa   : > { %p296_p6 = scmp.lt.s32.totalorder (!%p252_p3), %s2259_s8, 15  ;;  %p2263_p7 = scmp.ne.s32.totalorder (!%p252_p3), %s2543_s24, 0 }
  0x10   : > { %s4019_s25 = smov (!%p288_p5, %s2547_s25), 1  ;;  %s4021_s8 = smov (!%p296_p6, %s2259_s8), 15 }
  0x11   : > { %s2329_s9 = sshll.u32 %s4019_s25, 8  ;;  %s2261_s10 = sshll.u32 %s4019_s25, 5  ;;  %v349_v0 = vld [vmem:[%s3965_s1] sm:$0xff] (!%p2263_p7)  ;;  %vm357_vm0 = vcmask (!%p2263_p7), 64512   ;;  %vm308_vm1 = vcmask (!%p2263_p7), 130048   ;;  %v2561_v5 = vmov (!%p2263_p7), 0.0  }
  0x12   : > { %s2638_s13 = scalar_lea.vmem %s3964_s0, %s2329_s9  ;;  %s2260_s14 = sshll.u32 %s4021_s8, 1  ;;  %2382 = vmatprep.subr.mxu0 (!%p2263_p7), %v349_v0  ;;  %2464 = vmatprep.subr.mxu1 (!%p2263_p7), %v349_v0  ;;  %309 = vst.msk [vmem:[#allocation2] sm:$0xff] (!%p2263_p7), %vm308_vm1, %v2561_v5  ;;  %310 = vst.msk [vmem:[#allocation2 + $0x8] sm:$0xff] (!%p2263_p7), %vm308_vm1, %v2561_v5  ;;  %vm311_vm2 = vcmask (!%p2263_p7), 123904   ;;  %v2722_v34 = vld [vmem:[%s3966_s2] ss:$0 sm:$0xff] (!%p2263_p7) }
  0x13   : > { %s300_s15 = sadd.s32 %s2261_s10, %s2260_s14  ;;  %307 = sbr.rel (%p2263_p7) target bundleno = 284 (0x11c), region = 52  ;;  %v317_v1 = vld [vmem:[%s2638_s13] sm:$0xff] (!%p2263_p7)  ;;  %v318_v3 = vld [vmem:[%s2638_s13 + $0x8] sm:$0xff] (!%p2263_p7)  ;;  %314 = vst.msk [vmem:[#allocation2 + $0x198] sm:$0xff] (!%p2263_p7), %vm308_vm1, %v2561_v5  ;;  %315 = vst.msk [vmem:[#allocation2 + $0x1a0] sm:$0xff] (!%p2263_p7), %vm308_vm1, %v2561_v5  ;;  %2383 = vmatpush3.msra.mxu0 (!%p2263_p7), %v349_v0  ;;  %2465 = vmatpush3.msra.mxu1 (!%p2263_p7), %v349_v0  ;;  %vm775_vm3 = vcmask (!%p2263_p7), 1040384  }
  0x14   : > { %s2262_s16 = sshll.u32 %s300_s15, 3  ;;  %v333_v2 = vld [vmem:[%s2638_s13 + $0x80] sm:$0xff] (!%p2263_p7)  ;;  %v334_v4 = vld [vmem:[%s2638_s13 + $0x88] sm:$0xff] (!%p2263_p7)  ;;  %v319_v6 = vld [vmem:[%s2638_s13 + $0x10] sm:$0xff] (!%p2263_p7)  ;;  %312 = vst.msk [vmem:[#allocation2 + $0x10] sm:$0x3] (!%p2263_p7), %vm311_vm2, %v2561_v5  ;;  %2384 = vmatprep.mubr.msk.f32.mxu0 (!%p2263_p7), %vm357_vm0, %v317_v1 }
  0x15   : > { %s2643_s19 = scalar_lea.vmem %s3971_s7, %s2262_s16  ;;  %v335_v7 = vld [vmem:[%s2638_s13 + $0x90] sm:$0xff] (!%p2263_p7)  ;;  %316 = vst.msk [vmem:[#allocation2 + $0x1a8] sm:$0x3] (!%p2263_p7), %vm311_vm2, %v2561_v5  ;;  %2408 = vmatprep.mubr.msk.f32.mxu1 (!%p2263_p7), %vm357_vm0, %v333_v2  ;;  %2385 = vmatmul.mubr.msk.f32.vlgmr.msra.gmra.mrb[0].mxu0 (!%p2263_p7), %vm357_vm0, %v318_v3  ;;  %v320_v8 = vld [vmem:[%s2638_s13 + $0x18] sm:$0xff] (!%p2263_p7)  ;;  %v321_v10 = vld [vmem:[%s2638_s13 + $0x20] sm:$0xff] (!%p2263_p7) }
  0x16   : > { %2409 = vmatmul.mubr.msk.f32.vlgmr.msra.gmra.mrb[0].mxu1 (!%p2263_p7), %vm357_vm0, %v334_v4  ;;  %2387 = vmatprep.mubr.msk.f32.mxu0 (!%p2263_p7), %vm357_vm0, %v319_v6  ;;  %v336_v9 = vld [vmem:[%s2638_s13 + $0x98] sm:$0xff] (!%p2263_p7)  ;;  %v337_v11 = vld [vmem:[%s2638_s13 + $0xa0] sm:$0xff] (!%p2263_p7)  ;;  %v322_v12 = vld [vmem:[%s2638_s13 + $0x28] sm:$0xff] (!%p2263_p7) }
  0x17   : > { %2411 = vmatprep.mubr.msk.f32.mxu1 (!%p2263_p7), %vm357_vm0, %v335_v7  ;;  %v338_v13 = vld [vmem:[%s2638_s13 + $0xa8] sm:$0xff] (!%p2263_p7)  ;;  %v323_v14 = vld [vmem:[%s2638_s13 + $0x30] sm:$0xff] (!%p2263_p7)  ;;  %v324_v16 = vld [vmem:[%s2638_s13 + $0x38] sm:$0xff] (!%p2263_p7) }
  0x18   : > { %v339_v15 = vld [vmem:[%s2638_s13 + $0xb0] sm:$0xff] (!%p2263_p7)  ;;  %v340_v17 = vld [vmem:[%s2638_s13 + $0xb8] sm:$0xff] (!%p2263_p7)  ;;  %v325_v18 = vld [vmem:[%s2638_s13 + $0x40] sm:$0xff] (!%p2263_p7) }
  0x19   : > { %2388 = vmatmul.mubr.msk.f32.gmra.mrb[2].mxu0 (!%p2263_p7), %vm357_vm0, %v320_v8  ;;  %v341_v19 = vld [vmem:[%s2638_s13 + $0xc0] sm:$0xff] (!%p2263_p7)  ;;  %v326_v20 = vld [vmem:[%s2638_s13 + $0x48] sm:$0xff] (!%p2263_p7)  ;;  %v327_v22 = vld [vmem:[%s2638_s13 + $0x50] sm:$0xff] (!%p2263_p7) }
  0x1a   : > { %2412 = vmatmul.mubr.msk.f32.gmra.mrb[2].mxu1 %vm357_vm0, %v336_v9  ;;  %2390 = vmatprep.mubr.msk.f32.mxu0 %vm357_vm0, %v321_v10  ;;  %v342_v21 = vld [vmem:[%s2638_s13 + $0xc8] sm:$0xff]  ;;  %v343_v23 = vld [vmem:[%s2638_s13 + $0xd0] sm:$0xff]  ;;  %v328_v24 = vld [vmem:[%s2638_s13 + $0x58] sm:$0xff] }
  0x1b   : > { %2414 = vmatprep.mubr.msk.f32.mxu1 %vm357_vm0, %v337_v11  ;;  %v344_v25 = vld [vmem:[%s2638_s13 + $0xd8] sm:$0xff]  ;;  %v329_v26 = vld [vmem:[%s2638_s13 + $0x60] sm:$0xff]  ;;  %v330_v28 = vld [vmem:[%s2638_s13 + $0x68] sm:$0xff] }
  0x1c   : > { %v345_v27 = vld [vmem:[%s2638_s13 + $0xe0] sm:$0xff]  ;;  %v346_v29 = vld [vmem:[%s2638_s13 + $0xe8] sm:$0xff]  ;;  %v331_v30 = vld [vmem:[%s2638_s13 + $0x70] sm:$0xff] }
  0x1d   : > { %2391 = vmatmul.mubr.msk.f32.gmra.mrb[4].mxu0 %vm357_vm0, %v322_v12  ;;  %v347_v31 = vld [vmem:[%s2638_s13 + $0xf0] sm:$0xff]  ;;  %v332_v32 = vld [vmem:[%s2638_s13 + $0x78] sm:$0xff] }
  0x1e   : > { %2415 = vmatmul.mubr.msk.f32.gmra.mrb[4].mxu1 %vm357_vm0, %v338_v13  ;;  %2393 = vmatprep.mubr.msk.f32.mxu0 %vm357_vm0, %v323_v14  ;;  %v348_v33 = vld [vmem:[%s2638_s13 + $0xf8] sm:$0xff] }
  0x1f   : > { %2417 = vmatprep.mubr.msk.f32.mxu1 %vm357_vm0, %v339_v15 }
  0x21   : > { %2394 = vmatmul.mubr.msk.f32.gmra.mrb[6].mxu0 %vm357_vm0, %v324_v16 }
  0x22   : > { %2418 = vmatmul.mubr.msk.f32.gmra.mrb[6].mxu1 %vm357_vm0, %v340_v17  ;;  %2396 = vmatprep.mubr.msk.f32.mxu0 %vm357_vm0, %v325_v18 }
  0x23   : > { %2420 = vmatprep.mubr.msk.f32.mxu1 %vm357_vm0, %v341_v19 }
  0x25   : > { %2397 = vmatmul.mubr.msk.f32.gmra.mrb[8].mxu0 %vm357_vm0, %v326_v20 }
  0x26   : > { %2421 = vmatmul.mubr.msk.f32.gmra.mrb[8].mxu1 %vm357_vm0, %v342_v21  ;;  %2399 = vmatprep.mubr.msk.f32.mxu0 %vm357_vm0, %v327_v22 }
  0x27   : > { %2423 = vmatprep.mubr.msk.f32.mxu1 %vm357_vm0, %v343_v23 }
  0x29   : > { %2400 = vmatmul.mubr.msk.f32.gmra.mrb[10].mxu0 %vm357_vm0, %v328_v24 }
  0x2a   : > { %2424 = vmatmul.mubr.msk.f32.gmra.mrb[10].mxu1 %vm357_vm0, %v344_v25  ;;  %2402 = vmatprep.mubr.msk.f32.mxu0 %vm357_vm0, %v329_v26 }
  0x2b   : > { %2426 = vmatprep.mubr.msk.f32.mxu1 %vm357_vm0, %v345_v27 }
  0x2d   : > { %2403 = vmatmul.mubr.msk.f32.gmra.mrb[12].mxu0 %vm357_vm0, %v330_v28 }
  0x2e   : > { %2427 = vmatmul.mubr.msk.f32.gmra.mrb[12].mxu1 %vm357_vm0, %v346_v29  ;;  %2405 = vmatprep.mubr.msk.f32.mxu0 %vm357_vm0, %v331_v30 }
  0x2f   : > { %2429 = vmatprep.mubr.msk.f32.mxu1 %vm357_vm0, %v347_v31 }
  0x31   : > { %2406 = vmatmul.mubr.msk.f32.gmra.mrb[14].mxu0 %vm357_vm0, %v332_v32 }
  0x32   : > { %2430 = vmatmul.mubr.msk.f32.gmra.mrb[14].mxu1 %vm357_vm0, %v348_v33 }
  0xe8   : > { %v2386_v35 = vpop.f32.mrb[0].mxu0 }
  0xe9   : > { %v2410_v36 = vpop.f32.mrb[0].mxu1  ;;  %v526_v37 = vadd.f32 %v2386_v35, %v2722_v34  ;;  %v520_v39 = vpop.f32.mrb[1].mxu0 }
  0xea   : > { %v606_v38 = vadd.f32 %v2410_v36, %v2722_v34  ;;  %v600_v40 = vpop.f32.mrb[1].mxu1  ;;  %v521_v41 = vadd.f32 %v2722_v34, %v520_v39 }
  0xeb   : > { %v601_v42 = vadd.f32 %v2722_v34, %v600_v40  ;;  %v680_v43 = vmax.f32 %v526_v37, 0.0 }
  0xec   : > { %v696_v44 = vmax.f32 %v606_v38, 0.0  ;;  %v679_v45 = vmax.f32 %v521_v41, 0.0  ;;  %v2389_v47 = vpop.f32.mrb[2].mxu0 }
  0xed   : > { %v695_v46 = vmax.f32 %v601_v42, 0.0  ;;  %v2413_v48 = vpop.f32.mrb[2].mxu1  ;;  %v712_v49 = vmin.f32 %v680_v43, 6.0  ;;  %v536_v51 = vadd.f32 %v2389_v47, %v2722_v34  ;;  %v530_v53 = vpop.f32.mrb[3].mxu0 }
  0xee   : > { %v728_v50 = vmin.f32 %v696_v44, 6.0  ;;  %v616_v52 = vadd.f32 %v2413_v48, %v2722_v34  ;;  %v610_v54 = vpop.f32.mrb[3].mxu1  ;;  %v711_v55 = vmin.f32 %v679_v45, 6.0  ;;  %v531_v57 = vadd.f32 %v2722_v34, %v530_v53 }
  0xef   : > { %v727_v56 = vmin.f32 %v695_v46, 6.0  ;;  %v611_v58 = vadd.f32 %v2722_v34, %v610_v54  ;;  %v777_v59 = vrot.slane %v712_v49, 7  ;;  %v682_v61 = vmax.f32 %v536_v51, 0.0 }
  0xf0   : > { %v801_v60 = vrot.slane %v728_v50, 7  ;;  %v698_v62 = vmax.f32 %v616_v52, 0.0  ;;  %v776_v63 = vrot.slane %v711_v55, 7  ;;  %v681_v1 = vmax.f32 %v531_v57, 0.0  ;;  %v2392_v3 = vpop.f32.mrb[4].mxu0 }
  0xf1   : > { %v800_v0 = vrot.slane %v727_v56, 7  ;;  %v697_v2 = vmax.f32 %v611_v58, 0.0  ;;  %v2416_v4 = vpop.f32.mrb[4].mxu1  ;;  %v888_v5 = vsel %vm775_vm3, %v777_v59, 0.0  ;;  %v714_v7 = vmin.f32 %v682_v61, 6.0  ;;  %v540_v9 = vpop.f32.mrb[5].mxu0 }
  0xf2   : > { %v896_v6 = vsel %vm775_vm3, %v801_v60, 0.0  ;;  %v730_v8 = vmin.f32 %v698_v62, 6.0  ;;  %v620_v10 = vpop.f32.mrb[5].mxu1  ;;  %907 = vst.msk [vmem:[#allocation2 + $0x28] sm:$0x3] %vm311_vm2, %v888_v5  ;;  %v778_v11 = vsel %vm775_vm3, %v776_v63, %v777_v59  ;;  %v872_v12 = vsel %vm775_vm3, 0.0, %v776_v63 }
  0xf3   : > { %931 = vst.msk [vmem:[#allocation2 + $0xe8] sm:$0x3] %vm311_vm2, %v896_v6  ;;  %v802_v13 = vsel %vm775_vm3, %v800_v0, %v801_v60  ;;  %v880_v14 = vsel %vm775_vm3, 0.0, %v800_v0  ;;  %v780_v15 = vrot.slane %v714_v7, 7  ;;  %v713_v17 = vmin.f32 %v681_v1, 6.0 }
  0xf4   : > { %905 = vst.msk [vmem:[#allocation2 + $0x18] sm:$0xff] %vm308_vm1, %v872_v12  ;;  %906 = vst.msk [vmem:[#allocation2 + $0x20] sm:$0xff] %vm308_vm1, %v778_v11  ;;  %v804_v16 = vrot.slane %v730_v8, 7  ;;  %v729_v18 = vmin.f32 %v697_v2, 6.0  ;;  %v546_v19 = vadd.f32 %v2392_v3, %v2722_v34  ;;  %v626_v20 = vadd.f32 %v2416_v4, %v2722_v34  ;;  %v2395_v23 = vpop.f32.mrb[6].mxu0 }
  0xf5   : > { %929 = vst.msk [vmem:[#allocation2 + $0xd8] sm:$0xff] %vm308_vm1, %v880_v14  ;;  %930 = vst.msk [vmem:[#allocation2 + $0xe0] sm:$0xff] %vm308_vm1, %v802_v13  ;;  %v541_v21 = vadd.f32 %v2722_v34, %v540_v9  ;;  %v621_v22 = vadd.f32 %v2722_v34, %v620_v10  ;;  %v2419_v24 = vpop.f32.mrb[6].mxu1  ;;  %v889_v25 = vsel %vm775_vm3, %v780_v15, 0.0  ;;  %v779_v27 = vrot.slane %v713_v17, 7  ;;  %v550_v29 = vpop.f32.mrb[7].mxu0 }
  0xf6   : > { %v897_v26 = vsel %vm775_vm3, %v804_v16, 0.0  ;;  %v803_v28 = vrot.slane %v729_v18, 7  ;;  %v630_v30 = vpop.f32.mrb[7].mxu1  ;;  %910 = vst.msk [vmem:[#allocation2 + $0x40] sm:$0x3] %vm311_vm2, %v889_v25  ;;  %v684_v31 = vmax.f32 %v546_v19, 0.0  ;;  %v556_v46 = vadd.f32 %v2395_v23, %v2722_v34 }
  0xf7   : > { %934 = vst.msk [vmem:[#allocation2 + $0x100] sm:$0x3] %vm311_vm2, %v897_v26  ;;  %v700_v32 = vmax.f32 %v626_v20, 0.0  ;;  %v683_v33 = vmax.f32 %v541_v21, 0.0  ;;  %v699_v35 = vmax.f32 %v621_v22, 0.0  ;;  %v781_v36 = vsel %vm775_vm3, %v779_v27, %v780_v15 }
  0xf8   : > { %v873_v37 = vsel %vm775_vm3, 0.0, %v779_v27  ;;  %v805_v38 = vsel %vm775_vm3, %v803_v28, %v804_v16  ;;  %v881_v39 = vsel %vm775_vm3, 0.0, %v803_v28  ;;  %909 = vst.msk [vmem:[#allocation2 + $0x38] sm:$0xff] %vm308_vm1, %v781_v36  ;;  %v716_v40 = vmin.f32 %v684_v31, 6.0  ;;  %v2398_v44 = vpop.f32.mrb[8].mxu0 }
  0xf9   : > { %908 = vst.msk [vmem:[#allocation2 + $0x30] sm:$0xff] %vm308_vm1, %v873_v37  ;;  %932 = vst.msk [vmem:[#allocation2 + $0xf0] sm:$0xff] %vm308_vm1, %v881_v39  ;;  %v732_v41 = vmin.f32 %v700_v32, 6.0  ;;  %v715_v42 = vmin.f32 %v683_v33, 6.0  ;;  %v731_v43 = vmin.f32 %v699_v35, 6.0  ;;  %v2422_v45 = vpop.f32.mrb[8].mxu1  ;;  %v636_v47 = vadd.f32 %v2419_v24, %v2722_v34 }
  0xfa   : > { %933 = vst.msk [vmem:[#allocation2 + $0xf8] sm:$0xff] %vm308_vm1, %v805_v38  ;;  %v551_v48 = vadd.f32 %v2722_v34, %v550_v29  ;;  %v631_v49 = vadd.f32 %v2722_v34, %v630_v30  ;;  %v560_v50 = vpop.f32.mrb[9].mxu0  ;;  %v640_v51 = vpop.f32.mrb[9].mxu1  ;;  %v783_v52 = vrot.slane %v716_v40, 7  ;;  %v686_v56 = vmax.f32 %v556_v46, 0.0 }
  0xfb   : > { %v807_v53 = vrot.slane %v732_v41, 7  ;;  %v782_v54 = vrot.slane %v715_v42, 7  ;;  %v806_v55 = vrot.slane %v731_v43, 7  ;;  %v702_v57 = vmax.f32 %v636_v47, 0.0 }
  0xfc   : > { %v685_v58 = vmax.f32 %v551_v48, 0.0  ;;  %v701_v59 = vmax.f32 %v631_v49, 0.0  ;;  %v890_v60 = vsel %vm775_vm3, %v783_v52, 0.0  ;;  %v2401_v0 = vpop.f32.mrb[10].mxu0  ;;  %v718_v4 = vmin.f32 %v686_v56, 6.0 }
  0xfd   : > { %v898_v61 = vsel %vm775_vm3, %v807_v53, 0.0  ;;  %v784_v62 = vsel %vm775_vm3, %v782_v54, %v783_v52  ;;  %v874_v63 = vsel %vm775_vm3, 0.0, %v782_v54  ;;  %v2425_v1 = vpop.f32.mrb[10].mxu1  ;;  %913 = vst.msk [vmem:[#allocation2 + $0x58] sm:$0x3] %vm311_vm2, %v890_v60  ;;  %v808_v2 = vsel %vm775_vm3, %v806_v55, %v807_v53  ;;  %v570_v6 = vpop.f32.mrb[11].mxu0 }
  0xfe   : > { %937 = vst.msk [vmem:[#allocation2 + $0x118] sm:$0x3] %vm311_vm2, %v898_v61  ;;  %v882_v3 = vsel %vm775_vm3, 0.0, %v806_v55  ;;  %v734_v5 = vmin.f32 %v702_v57, 6.0  ;;  %v650_v7 = vpop.f32.mrb[11].mxu1  ;;  %v717_v8 = vmin.f32 %v685_v58, 6.0  ;;  %v566_v10 = vadd.f32 %v2398_v44, %v2722_v34 }
  0xff   : > { %911 = vst.msk [vmem:[#allocation2 + $0x48] sm:$0xff] %vm308_vm1, %v874_v63  ;;  %912 = vst.msk [vmem:[#allocation2 + $0x50] sm:$0xff] %vm308_vm1, %v784_v62  ;;  %v733_v9 = vmin.f32 %v701_v59, 6.0  ;;  %v646_v11 = vadd.f32 %v2422_v45, %v2722_v34  ;;  %v786_v12 = vrot.slane %v718_v4, 7  ;;  %v561_v14 = vadd.f32 %v2722_v34, %v560_v50 }
 0x100   : > { %935 = vst.msk [vmem:[#allocation2 + $0x108] sm:$0xff] %vm308_vm1, %v882_v3  ;;  %936 = vst.msk [vmem:[#allocation2 + $0x110] sm:$0xff] %vm308_vm1, %v808_v2  ;;  %v810_v13 = vrot.slane %v734_v5, 7  ;;  %v641_v15 = vadd.f32 %v2722_v34, %v640_v51  ;;  %v785_v16 = vrot.slane %v717_v8, 7  ;;  %v688_v18 = vmax.f32 %v566_v10, 0.0  ;;  %v2404_v20 = vpop.f32.mrb[12].mxu0 }
 0x101   : > { %v809_v17 = vrot.slane %v733_v9, 7  ;;  %v704_v19 = vmax.f32 %v646_v11, 0.0  ;;  %v2428_v21 = vpop.f32.mrb[12].mxu1  ;;  %v891_v22 = vsel %vm775_vm3, %v786_v12, 0.0  ;;  %v687_v24 = vmax.f32 %v561_v14, 0.0  ;;  %v580_v26 = vpop.f32.mrb[13].mxu0 }
 0x102   : > { %v899_v23 = vsel %vm775_vm3, %v810_v13, 0.0  ;;  %v703_v25 = vmax.f32 %v641_v15, 0.0  ;;  %v660_v27 = vpop.f32.mrb[13].mxu1  ;;  %916 = vst.msk [vmem:[#allocation2 + $0x70] sm:$0x3] %vm311_vm2, %v891_v22  ;;  %v787_v28 = vsel %vm775_vm3, %v785_v16, %v786_v12  ;;  %v875_v29 = vsel %vm775_vm3, 0.0, %v785_v16 }
 0x103   : > { %940 = vst.msk [vmem:[#allocation2 + $0x130] sm:$0x3] %vm311_vm2, %v899_v23  ;;  %v811_v30 = vsel %vm775_vm3, %v809_v17, %v810_v13  ;;  %v883_v31 = vsel %vm775_vm3, 0.0, %v809_v17  ;;  %v720_v32 = vmin.f32 %v688_v18, 6.0  ;;  %v736_v33 = vmin.f32 %v704_v19, 6.0 }
 0x104   : > { %914 = vst.msk [vmem:[#allocation2 + $0x60] sm:$0xff] %vm308_vm1, %v875_v29  ;;  %915 = vst.msk [vmem:[#allocation2 + $0x68] sm:$0xff] %vm308_vm1, %v787_v28  ;;  %v719_v35 = vmin.f32 %v687_v24, 6.0  ;;  %v735_v36 = vmin.f32 %v703_v25, 6.0  ;;  %v576_v37 = vadd.f32 %v2401_v0, %v2722_v34  ;;  %v656_v38 = vadd.f32 %v2425_v1, %v2722_v34  ;;  %v2407_v41 = vpop.f32.mrb[14].mxu0 }
 0x105   : > { %938 = vst.msk [vmem:[#allocation2 + $0x120] sm:$0xff] %vm308_vm1, %v883_v31  ;;  %939 = vst.msk [vmem:[#allocation2 + $0x128] sm:$0xff] %vm308_vm1, %v811_v30  ;;  %v571_v39 = vadd.f32 %v2722_v34, %v570_v6  ;;  %v651_v40 = vadd.f32 %v2722_v34, %v650_v7  ;;  %v2431_v42 = vpop.f32.mrb[14].mxu1  ;;  %v789_v43 = vrot.slane %v720_v32, 7  ;;  %v813_v44 = vrot.slane %v736_v33, 7  ;;  %v590_v47 = vpop.f32.mrb[15].mxu0 }
 0x106   : > { %v788_v45 = vrot.slane %v719_v35, 7  ;;  %v812_v46 = vrot.slane %v735_v36, 7  ;;  %v670_v48 = vpop.f32.mrb[15].mxu1  ;;  %v690_v49 = vmax.f32 %v576_v37, 0.0  ;;  %v706_v50 = vmax.f32 %v656_v38, 0.0 }
 0x107   : > { %v689_v51 = vmax.f32 %v571_v39, 0.0  ;;  %v705_v52 = vmax.f32 %v651_v40, 0.0  ;;  %v892_v53 = vsel %vm775_vm3, %v789_v43, 0.0  ;;  %v900_v54 = vsel %vm775_vm3, %v813_v44, 0.0 }
 0x108   : > { %v790_v55 = vsel %vm775_vm3, %v788_v45, %v789_v43  ;;  %v876_v56 = vsel %vm775_vm3, 0.0, %v788_v45  ;;  %919 = vst.msk [vmem:[#allocation2 + $0x88] sm:$0x3] %vm311_vm2, %v892_v53  ;;  %943 = vst.msk [vmem:[#allocation2 + $0x148] sm:$0x3] %vm311_vm2, %v900_v54  ;;  %v814_v57 = vsel %vm775_vm3, %v812_v46, %v813_v44  ;;  %v884_v58 = vsel %vm775_vm3, 0.0, %v812_v46 }
 0x109   : > { %917 = vst.msk [vmem:[#allocation2 + $0x78] sm:$0xff] %vm308_vm1, %v876_v56  ;;  %918 = vst.msk [vmem:[#allocation2 + $0x80] sm:$0xff] %vm308_vm1, %v790_v55  ;;  %v722_v59 = vmin.f32 %v690_v49, 6.0  ;;  %v738_v60 = vmin.f32 %v706_v50, 6.0  ;;  %v721_v61 = vmin.f32 %v689_v51, 6.0  ;;  %v737_v62 = vmin.f32 %v705_v52, 6.0 }
 0x10a   : > { %941 = vst.msk [vmem:[#allocation2 + $0x138] sm:$0xff] %vm308_vm1, %v884_v58  ;;  %942 = vst.msk [vmem:[#allocation2 + $0x140] sm:$0xff] %vm308_vm1, %v814_v57  ;;  %v586_v63 = vadd.f32 %v2404_v20, %v2722_v34  ;;  %v666_v0 = vadd.f32 %v2428_v21, %v2722_v34  ;;  %v581_v3 = vadd.f32 %v2722_v34, %v580_v26 }
 0x10b   : > { %v792_v1 = vrot.slane %v722_v59, 7  ;;  %v816_v2 = vrot.slane %v738_v60, 7  ;;  %v661_v4 = vadd.f32 %v2722_v34, %v660_v27  ;;  %v791_v5 = vrot.slane %v721_v61, 7 }
 0x10c   : > { %v815_v6 = vrot.slane %v737_v62, 7  ;;  %v692_v7 = vmax.f32 %v586_v63, 0.0  ;;  %v708_v8 = vmax.f32 %v666_v0, 0.0  ;;  %v691_v11 = vmax.f32 %v581_v3, 0.0 }
 0x10d   : > { %v893_v9 = vsel %vm775_vm3, %v792_v1, 0.0  ;;  %v901_v10 = vsel %vm775_vm3, %v816_v2, 0.0  ;;  %v707_v12 = vmax.f32 %v661_v4, 0.0  ;;  %v793_v13 = vsel %vm775_vm3, %v791_v5, %v792_v1 }
 0x10e   : > { %922 = vst.msk [vmem:[#allocation2 + $0xa0] sm:$0x3] %vm311_vm2, %v893_v9  ;;  %946 = vst.msk [vmem:[#allocation2 + $0x160] sm:$0x3] %vm311_vm2, %v901_v10  ;;  %v877_v14 = vsel %vm775_vm3, 0.0, %v791_v5  ;;  %v817_v15 = vsel %vm775_vm3, %v815_v6, %v816_v2  ;;  %v885_v16 = vsel %vm775_vm3, 0.0, %v815_v6  ;;  %v596_v21 = vadd.f32 %v2407_v41, %v2722_v34 }
 0x10f   : > { %920 = vst.msk [vmem:[#allocation2 + $0x90] sm:$0xff] %vm308_vm1, %v877_v14  ;;  %921 = vst.msk [vmem:[#allocation2 + $0x98] sm:$0xff] %vm308_vm1, %v793_v13  ;;  %v724_v17 = vmin.f32 %v692_v7, 6.0  ;;  %v740_v18 = vmin.f32 %v708_v8, 6.0  ;;  %v723_v19 = vmin.f32 %v691_v11, 6.0  ;;  %v739_v20 = vmin.f32 %v707_v12, 6.0 }
 0x110   : > { %944 = vst.msk [vmem:[#allocation2 + $0x150] sm:$0xff] %vm308_vm1, %v885_v16  ;;  %945 = vst.msk [vmem:[#allocation2 + $0x158] sm:$0xff] %vm308_vm1, %v817_v15  ;;  %v676_v22 = vadd.f32 %v2431_v42, %v2722_v34  ;;  %v591_v23 = vadd.f32 %v2722_v34, %v590_v47  ;;  %v671_v24 = vadd.f32 %v2722_v34, %v670_v48  ;;  %v694_v29 = vmax.f32 %v596_v21, 0.0 }
 0x111   : > { %v795_v25 = vrot.slane %v724_v17, 7  ;;  %v819_v26 = vrot.slane %v740_v18, 7  ;;  %v794_v27 = vrot.slane %v723_v19, 7  ;;  %v818_v28 = vrot.slane %v739_v20, 7 }
 0x112   : > { %v710_v30 = vmax.f32 %v676_v22, 0.0  ;;  %v693_v31 = vmax.f32 %v591_v23, 0.0  ;;  %v709_v32 = vmax.f32 %v671_v24, 0.0  ;;  %v726_v39 = vmin.f32 %v694_v29, 6.0 }
 0x113   : > { %v894_v33 = vsel %vm775_vm3, %v795_v25, 0.0  ;;  %v902_v35 = vsel %vm775_vm3, %v819_v26, 0.0  ;;  %v796_v36 = vsel %vm775_vm3, %v794_v27, %v795_v25  ;;  %v878_v37 = vsel %vm775_vm3, 0.0, %v794_v27 }
 0x114   : > { %925 = vst.msk [vmem:[#allocation2 + $0xb8] sm:$0x3] %vm311_vm2, %v894_v33  ;;  %949 = vst.msk [vmem:[#allocation2 + $0x178] sm:$0x3] %vm311_vm2, %v902_v35  ;;  %v820_v34 = vsel %vm775_vm3, %v818_v28, %v819_v26  ;;  %v886_v38 = vsel %vm775_vm3, 0.0, %v818_v28  ;;  %v742_v40 = vmin.f32 %v710_v30, 6.0 }
 0x115   : > { %923 = vst.msk [vmem:[#allocation2 + $0xa8] sm:$0xff] %vm308_vm1, %v878_v37  ;;  %924 = vst.msk [vmem:[#allocation2 + $0xb0] sm:$0xff] %vm308_vm1, %v796_v36  ;;  %v725_v41 = vmin.f32 %v693_v31, 6.0  ;;  %v741_v42 = vmin.f32 %v709_v32, 6.0  ;;  %v798_v43 = vrot.slane %v726_v39, 7 }
 0x116   : > { %947 = vst.msk [vmem:[#allocation2 + $0x168] sm:$0xff] %vm308_vm1, %v886_v38  ;;  %948 = vst.msk [vmem:[#allocation2 + $0x170] sm:$0xff] %vm308_vm1, %v820_v34  ;;  %v822_v44 = vrot.slane %v742_v40, 7 }
 0x117   : > { %v797_v45 = vrot.slane %v725_v41, 7  ;;  %v821_v46 = vrot.slane %v741_v42, 7  ;;  %v895_v47 = vsel %vm775_vm3, %v798_v43, 0.0 }
 0x118   : > { %v903_v48 = vsel %vm775_vm3, %v822_v44, 0.0  ;;  %928 = vst.msk [vmem:[#allocation2 + $0xd0] sm:$0x3] %vm311_vm2, %v895_v47 }
 0x119   : > { %952 = vst.msk [vmem:[#allocation2 + $0x190] sm:$0x3] %vm311_vm2, %v903_v48  ;;  %v799_v49 = vsel %vm775_vm3, %v797_v45, %v798_v43  ;;  %v879_v50 = vsel %vm775_vm3, 0.0, %v797_v45  ;;  %v823_v51 = vsel %vm775_vm3, %v821_v46, %v822_v44  ;;  %v887_v52 = vsel %vm775_vm3, 0.0, %v821_v46 }
 0x11a   : > { %926 = vst.msk [vmem:[#allocation2 + $0xc0] sm:$0xff] %vm308_vm1, %v879_v50  ;;  %927 = vst.msk [vmem:[#allocation2 + $0xc8] sm:$0xff] %vm308_vm1, %v799_v49 }
 0x11b   : > { %950 = vst.msk [vmem:[#allocation2 + $0x180] sm:$0xff] %vm308_vm1, %v887_v52  ;;  %951 = vst.msk [vmem:[#allocation2 + $0x188] sm:$0xff] %vm308_vm1, %v823_v51 }
 0x11c PF: > { %v1904_v53 = vld [vmem:[%s3969_s5] sm:$0xff]  ;;  %v1905_v54 = vld [vmem:[%s3969_s5 + $0x8] sm:$0xff]  ;;  %s2298_s11 = smul.u32 192, %s2543_s24  ;;  %vm1076_vm4 = vcmask 1046528   ;;  %vm1202_vm5 = vcmask 1045504   ;;  %vm1913_vm6 = vcmask 130048  }
 0x11d   : > { %v2460_v55 = vpack.c.bf16 %v1905_v54, %v1904_v53  ;;  %v2862_v56 = vld [vmem:[%s3967_s3] ss:$0 sm:$0xff]  ;;  %v2867_v57 = vld [vmem:[%s3967_s3 + $0x1] ss:$0 sm:$0xff]  ;;  %v2872_v58 = vld [vmem:[%s3967_s3 + $0x2] ss:$0 sm:$0xff] }
 0x11e   : > { %v2877_v59 = vld [vmem:[%s3967_s3 + $0x3] ss:$0 sm:$0xff]  ;;  %v2882_v60 = vld [vmem:[%s3967_s3 + $0x4] ss:$0 sm:$0xff]  ;;  %s2884_s25 = scalar_lea.vmem [#allocation2], %s2298_s11  ;;  %vm2141_vm7 = vcmask 64512  }
 0x11f   : > { %2461 = vmatprep.subr.bf16.mxu0 %v2460_v55  ;;  %2466 = vmatprep.subr.bf16.mxu1 %v2460_v55  ;;  %v2914_v8 = vld [vmem:[%s3967_s3 + $0x5] ss:$0 sm:$0xff]  ;;  %v2919_v9 = vld [vmem:[%s3967_s3 + $0x6] ss:$0 sm:$0xff]  ;;  %v2931_v14 = vld [vmem:[%s3967_s3 + $0x7] ss:$0 sm:$0xff] }
 0x120   : > { %2463 = vmatpush3.bf16.msra.mxu0 %v2460_v55  ;;  %2467 = vmatpush3.bf16.msra.mxu1 %v2460_v55  ;;  %v2944_v20 = vld [vmem:[%s3967_s3 + $0x8] ss:$0 sm:$0xff] }
 0x122   : > { %v956_v61 = vld [vmem:[%s2884_s25] sm:$0xff]  ;;  %v2888_v62 = vld [vmem:[%s2884_s25 + $0x8] sm:$0xff]  ;;  %v2891_v63 = vld [vmem:[%s2884_s25 + $0x18] sm:$0xff] }
 0x123   : > { %v991_v0 = vmul.f32 %v2862_v56, %v956_v61  ;;  %v1028_v1 = vmul.f32 %v2867_v57, %v956_v61  ;;  %v2897_v2 = vmul.f32 %v2867_v57, %v2888_v62  ;;  %v2900_v3 = vld [vmem:[%s2884_s25 + $0x20] sm:$0xff]  ;;  %v1154_v4 = vmul.f32 %v2872_v58, %v956_v61  ;;  %v2934_v15 = vld [vmem:[%s2884_s25 + $0x30] sm:$0xff]  ;;  %v2953_v25 = vld [vmem:[%s2884_s25 + $0x38] sm:$0xff] }
 0x124   : > { %v2905_v5 = vmul.f32 %v2872_v58, %v2888_v62  ;;  %v1280_v6 = vmul.f32 %v2877_v59, %v2891_v63  ;;  %v1317_v7 = vmul.f32 %v2882_v60, %v2891_v63  ;;  %v2924_v12 = vmul.f32 %v2882_v60, %v2900_v3  ;;  %v2962_v30 = vld [vmem:[%s2884_s25 + $0x60] sm:$0xff]  ;;  %v2978_v36 = vld [vmem:[%s2884_s25 + $0x68] sm:$0xff]  ;;  %v2990_v45 = vld [vmem:[%s2884_s25 + $0x78] sm:$0xff] }
 0x125   : > { %v1077_v10 = vrot.slane %v1028_v1, 1  ;;  %v1078_v11 = vrot.slane %v2897_v2, 1  ;;  %v1442_v13 = vmul.f32 %v2914_v8, %v2891_v63  ;;  %v1203_v16 = vrot.slane %v1154_v4, 2  ;;  %v3011_v54 = vld [vmem:[%s2884_s25 + $0x80] sm:$0xff]  ;;  %v3016_v1 = vld [vmem:[%s2884_s25 + $0x90] sm:$0xff] }
 0x126   : > { %v1204_v17 = vrot.slane %v2905_v5, 2  ;;  %v1365_v18 = vrot.slane %v1317_v7, 1  ;;  %v2939_v19 = vmul.f32 %v2914_v8, %v2900_v3  ;;  %v1366_v22 = vrot.slane %v2924_v12, 1 }
 0x127   : > { %v1079_v21 = vsel %vm1076_vm4, %v1077_v10, %v1078_v11  ;;  %v1490_v23 = vrot.slane %v1442_v13, 2  ;;  %v1567_v24 = vmul.f32 %v2919_v9, %v2934_v15  ;;  %v1604_v29 = vmul.f32 %v2931_v14, %v2934_v15 }
 0x128   : > { %v1133_v26 = vadd.f32 %v1079_v21, %v991_v0  ;;  %v1205_v27 = vsel %vm1202_vm5, %v1203_v16, %v1204_v17  ;;  %v1491_v28 = vrot.slane %v2939_v19, 2  ;;  %v1367_v31 = vsel %vm1076_vm4, %v1365_v18, %v1366_v22 }
 0x129   : > { %v2969_v32 = vmul.f32 %v2931_v14, %v2953_v25  ;;  %v1729_v33 = vmul.f32 %v2944_v20, %v2934_v15  ;;  %v2975_v35 = vmul.f32 %v2944_v20, %v2953_v25  ;;  %v1652_v38 = vrot.slane %v1604_v29, 1 }
 0x12a   : > { %v1259_v37 = vadd.f32 %v1205_v27, %v1133_v26  ;;  %v1492_v34 = vsel %vm1202_vm5, %v1490_v23, %v1491_v28  ;;  %v999_v39 = vmul.f32 %v2862_v56, %v2962_v30  ;;  %v1040_v43 = vmul.f32 %v2867_v57, %v2962_v30  ;;  %v3039_v23 = vld [vmem:[%s2884_s25 + $0x98] sm:$0xff] }
 0x12b   : > { %v1653_v40 = vrot.slane %v2969_v32, 1  ;;  %v1777_v41 = vrot.slane %v1729_v33, 2  ;;  %v1778_v42 = vrot.slane %v2975_v35, 2  ;;  %v2994_v46 = vmul.f32 %v2867_v57, %v2978_v36 }
 0x12c   : > { %v1296_v44 = vadd.f32 %v1280_v6, %v1259_v37  ;;  %v1166_v47 = vmul.f32 %v2872_v58, %v2962_v30  ;;  %v3000_v48 = vmul.f32 %v2872_v58, %v2978_v36  ;;  %v1097_v51 = vrot.slane %v1040_v43, 1 }
 0x12d   : > { %v1654_v49 = vsel %vm1076_vm4, %v1652_v38, %v1653_v40  ;;  %v1779_v50 = vsel %vm1202_vm5, %v1777_v41, %v1778_v42  ;;  %v1288_v52 = vmul.f32 %v2877_v59, %v2990_v45  ;;  %v1098_v55 = vrot.slane %v2994_v46, 1 }
 0x12e   : > { %v1421_v53 = vadd.f32 %v1367_v31, %v1296_v44  ;;  %v1223_v61 = vrot.slane %v1166_v47, 2  ;;  %v1224_v0 = vrot.slane %v3000_v48, 2  ;;  %v1329_v4 = vmul.f32 %v2882_v60, %v2990_v45  ;;  %v958_v44 = vld [vmem:[%s2884_s25 + $0x10] sm:$0x3] }
 0x12f   : > { %v3022_v6 = vmul.f32 %v2882_v60, %v3011_v54  ;;  %v1454_v7 = vmul.f32 %v2914_v8, %v2990_v45  ;;  %v3028_v10 = vmul.f32 %v2914_v8, %v3011_v54  ;;  %v1099_v16 = vsel %vm1076_vm4, %v1097_v51, %v1098_v55 }
 0x130   : > { %v1546_v13 = vadd.f32 %v1492_v34, %v1421_v53  ;;  %v1225_v18 = vsel %vm1202_vm5, %v1223_v61, %v1224_v0  ;;  %v1575_v21 = vmul.f32 %v2919_v9, %v3016_v1  ;;  %v1141_v26 = vadd.f32 %v1099_v16, %v999_v39 }
 0x131   : > { %v1385_v27 = vrot.slane %v1329_v4, 1  ;;  %v3975_v29 = vrot.slane %v3022_v6, 1  ;;  %v1510_v31 = vrot.slane %v1454_v7, 2  ;;  %v3974_v37 = vrot.slane %v3028_v10, 2  ;;  %v3066_v4 = vld [vmem:[%s3968_s4] ss:$0 sm:$0xff] }
 0x132   : > { %v1583_v33 = vadd.f32 %v1567_v24, %v1546_v13  ;;  %v1616_v34 = vmul.f32 %v2931_v14, %v3016_v1  ;;  %v3047_v38 = vmul.f32 %v2931_v14, %v3039_v23  ;;  %v1267_v41 = vadd.f32 %v1225_v18, %v1141_v26 }
 0x133   : > { %v1387_v39 = vsel %vm1076_vm4, %v1385_v27, %v3975_v29  ;;  %v1741_v43 = vmul.f32 %v2944_v20, %v3016_v1  ;;  %v3056_v24 = vmul.f32 %v2944_v20, %v3039_v23  ;;  %v1512_v51 = vsel %vm1202_vm5, %v1510_v31, %v3974_v37  ;;  %v3075_v27 = vld [vmem:[%s2884_s25 + $0x28] sm:$0x3]  ;;  %v3103_v37 = vld [vmem:[%s2884_s25 + $0x70] sm:$0x3] }
 0x134   : > { %v1708_v47 = vadd.f32 %v1654_v49, %v1583_v33  ;;  %v1672_v53 = vrot.slane %v1616_v34, 1  ;;  %v3973_v61 = vrot.slane %v3047_v38, 1  ;;  %v1304_v7 = vadd.f32 %v1288_v52, %v1267_v41 }
 0x135   : > { %v1797_v13 = vrot.slane %v1741_v43, 2  ;;  %v3972_v16 = vrot.slane %v3056_v24, 2  ;;  %v992_v49 = vmul.f32 %v2862_v56, %v2888_v62  ;;  %v1030_v31 = vmul.f32 %v2867_v57, %v958_v44  ;;  %v3088_v43 = vld [vmem:[%s2884_s25 + $0x40] sm:$0x3] }
 0x136   : > { %v1833_v18 = vadd.f32 %v1779_v50, %v1708_v47  ;;  %v1674_v26 = vsel %vm1076_vm4, %v1672_v53, %v3973_v61  ;;  %v1156_v33 = vmul.f32 %v2872_v58, %v958_v44  ;;  %v1429_v34 = vadd.f32 %v1387_v39, %v1304_v7 }
 0x137   : > { %v1799_v52 = vsel %vm1202_vm5, %v1797_v13, %v3972_v16  ;;  %v1281_v62 = vmul.f32 %v2877_v59, %v2900_v3  ;;  %v1319_v50 = vmul.f32 %v2882_v60, %v3075_v27  ;;  %v1080_v47 = vrot.slane %v1030_v31, 1 }
 0x138   : > { %v1856_v41 = vadd.f32 %v3066_v4, %v1833_v18  ;;  %v1206_v53 = vrot.slane %v1156_v33, 2  ;;  %v1444_v39 = vmul.f32 %v2914_v8, %v3075_v27  ;;  %v1554_v44 = vadd.f32 %v1512_v51, %v1429_v34 }
 0x139   : > { %v1368_v7 = vrot.slane %v1319_v50, 1  ;;  %v1568_v13 = vmul.f32 %v2919_v9, %v2953_v25  ;;  %v1606_v16 = vmul.f32 %v2931_v14, %v3088_v43  ;;  %v1081_v18 = vsel %vm1076_vm4, %v1078_v11, %v1080_v47 }
 0x13a   : > { %v1872_v61 = vmax.f32 %v1856_v41, 0.0  ;;  %v1207_v31 = vsel %vm1202_vm5, %v1204_v17, %v1206_v53  ;;  %v1493_v33 = vrot.slane %v1444_v39, 2  ;;  %v1591_v51 = vadd.f32 %v1575_v21, %v1554_v44  ;;  %v3119_v21 = vld [vmem:[%s2884_s25 + $0x88] sm:$0x3] }
 0x13b   : > { %v1134_v34 = vadd.f32 %v1081_v18, %v992_v49  ;;  %v1369_v50 = vsel %vm1076_vm4, %v1366_v22, %v1368_v7  ;;  %v1655_v29 = vrot.slane %v1606_v16, 1  ;;  %v1731_v5 = vmul.f32 %v2944_v20, %v3088_v43 }
 0x13c   : > { %v1888_v41 = vmin.f32 %v1872_v61, 6.0  ;;  %v1494_v2 = vsel %vm1202_vm5, %v1491_v28, %v1493_v33  ;;  %v1000_v11 = vmul.f32 %v2862_v56, %v2978_v36  ;;  %v1716_v17 = vadd.f32 %v1674_v26, %v1591_v51 }
 0x13d   : > { %v1260_v47 = vadd.f32 %v1207_v31, %v1134_v34  ;;  %v1656_v12 = vsel %vm1076_vm4, %v1653_v40, %v1655_v29  ;;  %v1042_v22 = vmul.f32 %v2867_v57, %v3103_v37  ;;  %v1780_v19 = vrot.slane %v1731_v5, 2  ;;  %v3139_v31 = vld [vmem:[%s2884_s25 + $0xa0] sm:$0x3] }
 0x13e   : > { %2436 = vmatprep.mubr.msk.f32.mxu0 %vm1913_vm6, %v1888_v41  ;;  %v1168_v28 = vmul.f32 %v2872_v58, %v3103_v37  ;;  %v1289_v61 = vmul.f32 %v2877_v59, %v3011_v54  ;;  %v1331_v32 = vmul.f32 %v2882_v60, %v3119_v21  ;;  %v1841_v16 = vadd.f32 %v1799_v52, %v1716_v17 }
 0x13f   : > { %v1297_v40 = vadd.f32 %v1281_v62, %v1260_v47  ;;  %v1100_v29 = vrot.slane %v1042_v22, 1  ;;  %v1456_v49 = vmul.f32 %v2914_v8, %v3119_v21  ;;  %v1781_v26 = vsel %vm1202_vm5, %v1778_v42, %v1780_v19 }
 0x140   : > { %v1226_v53 = vrot.slane %v1168_v28, 2  ;;  %v1388_v39 = vrot.slane %v1331_v32, 1  ;;  %v1576_v44 = vmul.f32 %v2919_v9, %v3039_v23  ;;  %v1864_v7 = vadd.f32 %v3066_v4, %v1841_v16 }
 0x141   : > { %v1422_v18 = vadd.f32 %v1369_v50, %v1297_v40  ;;  %v1101_v52 = vsel %vm1076_vm4, %v1098_v55, %v1100_v29  ;;  %v1513_v62 = vrot.slane %v1456_v49, 2  ;;  %v3990_v42 = vrot.slane %v3022_v6, 1 }
 0x142   : > { %v1142_v33 = vadd.f32 %v1101_v52, %v1000_v11  ;;  %v1227_v35 = vsel %vm1202_vm5, %v1224_v0, %v1226_v53  ;;  %v1618_v34 = vmul.f32 %v2931_v14, %v3139_v31  ;;  %v1880_v50 = vmax.f32 %v1864_v7, 0.0 }
 0x143   : > { %v1389_v51 = vsel %vm1076_vm4, %v3990_v42, %v1388_v39  ;;  %v1547_v41 = vadd.f32 %v1494_v2, %v1422_v18  ;;  %v3991_v5 = vrot.slane %v3028_v10, 2  ;;  %v1743_v55 = vmul.f32 %v2944_v20, %v3139_v31 }
 0x144   : > { %v1268_v11 = vadd.f32 %v1227_v35, %v1142_v33  ;;  %v1675_v48 = vrot.slane %v1618_v34, 1  ;;  %v993_v0 = vmul.f32 %v2862_v56, %v2891_v63  ;;  %v1031_v6 = vmul.f32 %v2867_v57, %v2891_v63 }
 0x145   : > { %v1514_v46 = vsel %vm1202_vm5, %v3991_v5, %v1513_v62  ;;  %v1896_v17 = vmin.f32 %v1880_v50, 6.0  ;;  %v1584_v47 = vadd.f32 %v1568_v13, %v1547_v41  ;;  %v1800_v22 = vrot.slane %v1743_v55, 2 }
 0x146   : > { %v3163_v2 = vmul.f32 %v2867_v57, %v2900_v3  ;;  %v1305_v10 = vadd.f32 %v1289_v61, %v1268_v11  ;;  %v3992_v19 = vrot.slane %v3047_v38, 1  ;;  %v1082_v32 = vrot.slane %v1031_v6, 1 }
 0x147   : > { %v1157_v16 = vmul.f32 %v2872_v58, %v2891_v63  ;;  %2448 = vmatprep.mubr.msk.f32.mxu1 %vm1913_vm6, %v1896_v17  ;;  %v1709_v40 = vadd.f32 %v1656_v12, %v1584_v47  ;;  %v3993_v29 = vrot.slane %v3056_v24, 2  ;;  %v3177_v61 = vmul.f32 %v2872_v58, %v2900_v3 }
 0x148   : > { %v1676_v28 = vsel %vm1076_vm4, %v3992_v19, %v1675_v48  ;;  %v1083_v49 = vrot.slane %v3163_v2, 1  ;;  %v1430_v38 = vadd.f32 %v1389_v51, %v1305_v10  ;;  %v1282_v39 = vmul.f32 %v2877_v59, %v2934_v15  ;;  %v3208_v48 = vld [vmem:[%s2884_s25 + $0x50] sm:$0xff] }
 0x149   : > { %v1801_v13 = vsel %vm1202_vm5, %v3993_v29, %v1800_v22  ;;  %v1208_v53 = vrot.slane %v1157_v16, 2  ;;  %v1320_v63 = vmul.f32 %v2882_v60, %v2934_v15  ;;  %v1834_v12 = vadd.f32 %v1781_v26, %v1709_v40  ;;  %v3195_v26 = vld [vmem:[%s2884_s25 + $0x48] sm:$0xff] }
 0x14a   : > { %v1084_v24 = vsel %vm1076_vm4, %v1082_v32, %v1083_v49  ;;  %v1209_v7 = vrot.slane %v3177_v61, 2  ;;  %v3189_v18 = vmul.f32 %v2882_v60, %v2953_v25  ;;  %v1555_v52 = vadd.f32 %v1514_v46, %v1430_v38 }
 0x14b   : > { %v1135_v62 = vadd.f32 %v1084_v24, %v993_v0  ;;  %v1370_v33 = vrot.slane %v1320_v63, 1  ;;  %v1445_v35 = vmul.f32 %v2914_v8, %v2934_v15  ;;  %v1857_v42 = vadd.f32 %v3066_v4, %v1834_v12 }
 0x14c   : > { %v1210_v51 = vsel %vm1202_vm5, %v1208_v53, %v1209_v7  ;;  %v1371_v34 = vrot.slane %v3189_v18, 1  ;;  %v3203_v50 = vmul.f32 %v2914_v8, %v2953_v25  ;;  %v1592_v41 = vadd.f32 %v1576_v44, %v1555_v52 }
 0x14d   : > { %v1261_v5 = vadd.f32 %v1210_v51, %v1135_v62  ;;  %v1495_v46 = vrot.slane %v1445_v35, 2  ;;  %v1569_v55 = vmul.f32 %v2919_v9, %v3195_v26  ;;  %v1873_v11 = vmax.f32 %v1857_v42, 0.0 }
 0x14e   : > { %v1372_v0 = vsel %vm1076_vm4, %v1370_v33, %v1371_v34  ;;  %v1496_v6 = vrot.slane %v3203_v50, 2  ;;  %v1607_v17 = vmul.f32 %v2931_v14, %v3195_v26  ;;  %v1717_v47 = vadd.f32 %v1676_v28, %v1592_v41 }
 0x14f   : > { %v1298_v22 = vadd.f32 %v1282_v39, %v1261_v5  ;;  %v3218_v44 = vmul.f32 %v2931_v14, %v3208_v48  ;;  %v1732_v10 = vmul.f32 %v2944_v20, %v3195_v26  ;;  %v1889_v19 = vmin.f32 %v1873_v11, 6.0 }
 0x150   : > { %v1497_v32 = vsel %vm1202_vm5, %v1495_v46, %v1496_v6  ;;  %v1657_v16 = vrot.slane %v1607_v17, 1  ;;  %v3227_v40 = vmul.f32 %v2944_v20, %v3208_v48  ;;  %v1842_v29 = vadd.f32 %v1801_v13, %v1717_v47 }
 0x151   : > { %v1423_v28 = vadd.f32 %v1372_v0, %v1298_v22  ;;  %v1658_v38 = vrot.slane %v3218_v44, 1  ;;  %v1782_v53 = vrot.slane %v1732_v10, 2  ;;  %2437 = vmatmul.mubr.msk.f32.vlgmr.msra.gmra.mrb[0].mxu0 %vm1913_vm6, %v1889_v19  ;;  %v1001_v63 = vmul.f32 %v2862_v56, %v2990_v45 }
 0x152   : > { %v3982_v39 = vrot.slane %v3227_v40, 2  ;;  %v1043_v12 = vmul.f32 %v2867_v57, %v2990_v45  ;;  %v3238_v24 = vmul.f32 %v2867_v57, %v3011_v54  ;;  %v1865_v13 = vadd.f32 %v3066_v4, %v1842_v29  ;;  %v3269_v29 = vld [vmem:[%s2884_s25 + $0xa8] sm:$0xff] }
 0x153   : > { %v1548_v52 = vadd.f32 %v1497_v32, %v1423_v28  ;;  %v1659_v62 = vsel %vm1076_vm4, %v1657_v16, %v1658_v38  ;;  %v1169_v33 = vmul.f32 %v2872_v58, %v2990_v45  ;;  %v3252_v41 = vmul.f32 %v2872_v58, %v3011_v54 }
 0x154   : > { %v1784_v35 = vsel %vm1202_vm5, %v1782_v53, %v3982_v39  ;;  %v1102_v42 = vrot.slane %v1043_v12, 1  ;;  %v3978_v51 = vrot.slane %v3238_v24, 1  ;;  %v1881_v5 = vmax.f32 %v1865_v13, 0.0 }
 0x155   : > { %v1585_v46 = vadd.f32 %v1569_v55, %v1548_v52  ;;  %v1228_v11 = vrot.slane %v1169_v33, 2  ;;  %v1290_v0 = vmul.f32 %v2877_v59, %v3016_v1  ;;  %v3977_v47 = vrot.slane %v3252_v41, 2 }
 0x156   : > { %v1104_v17 = vsel %vm1076_vm4, %v1102_v42, %v3978_v51  ;;  %v1332_v22 = vmul.f32 %v2882_v60, %v3016_v1  ;;  %v3264_v10 = vmul.f32 %v2882_v60, %v3039_v23  ;;  %v1897_v19 = vmin.f32 %v1881_v5, 6.0 }
 0x157   : > { %v1710_v55 = vadd.f32 %v1659_v62, %v1585_v46  ;;  %v1143_v32 = vadd.f32 %v1104_v17, %v1001_v63  ;;  %v1457_v16 = vmul.f32 %v2914_v8, %v3016_v1  ;;  %v1230_v28 = vsel %vm1202_vm5, %v1228_v11, %v3977_v47  ;;  %v3281_v63 = vld [vmem:[%s2884_s25 + $0xb0] sm:$0xff] }
 0x158   : > { %v1390_v53 = vrot.slane %v1332_v22, 1  ;;  %v3976_v12 = vrot.slane %v3264_v10, 1  ;;  %v3277_v13 = vmul.f32 %v2914_v8, %v3039_v23  ;;  %2449 = vmatmul.mubr.msk.f32.vlgmr.msra.gmra.mrb[0].mxu1 %vm1913_vm6, %v1897_v19  ;;  %v1577_v42 = vmul.f32 %v2919_v9, %v3269_v29 }
 0x159   : > { %v1835_v52 = vadd.f32 %v1784_v35, %v1710_v55  ;;  %v1269_v62 = vadd.f32 %v1230_v28, %v1143_v32  ;;  %v1515_v33 = vrot.slane %v1457_v16, 2  ;;  %v1619_v11 = vmul.f32 %v2931_v14, %v3269_v29 }
 0x15a   : > { %v1392_v5 = vsel %vm1076_vm4, %v1390_v53, %v3976_v12  ;;  %v3979_v46 = vrot.slane %v3277_v13, 2  ;;  %v3293_v17 = vmul.f32 %v2931_v14, %v3281_v63  ;;  %v1744_v19 = vmul.f32 %v2944_v20, %v3269_v29 }
 0x15b   : > { %v1858_v35 = vadd.f32 %v3066_v4, %v1835_v52  ;;  %v1306_v22 = vadd.f32 %v1290_v0, %v1269_v62  ;;  %v3300_v55 = vmul.f32 %v2944_v20, %v3281_v63  ;;  %v1677_v16 = vrot.slane %v1619_v11, 1 }
 0x15c   : > { %v1517_v32 = vsel %vm1202_vm5, %v1515_v33, %v3979_v46  ;;  %v3980_v28 = vrot.slane %v3293_v17, 1  ;;  %v994_v53 = vmul.f32 %v2862_v56, %v2900_v3  ;;  %v1802_v62 = vrot.slane %v1744_v19, 2 }
 0x15d   : > { %v1874_v52 = vmax.f32 %v1858_v35, 0.0  ;;  %v1431_v0 = vadd.f32 %v1392_v5, %v1306_v22  ;;  %v3981_v12 = vrot.slane %v3300_v55, 2  ;;  %v1033_v51 = vmul.f32 %v2867_v57, %v3075_v27  ;;  %v3324_v22 = vld [vmem:[%s2884_s25 + $0x58] sm:$0x3] }
 0x15e   : > { %v1679_v47 = vsel %vm1076_vm4, %v1677_v16, %v3980_v28  ;;  %v1159_v33 = vmul.f32 %v2872_v58, %v3075_v27  ;;  %v1283_v11 = vmul.f32 %v2877_v59, %v2953_v25  ;;  %v1322_v35 = vmul.f32 %v2882_v60, %v3088_v43 }
 0x15f   : > { %v1890_v46 = vmin.f32 %v1874_v52, 6.0  ;;  %v1556_v3 = vadd.f32 %v1517_v32, %v1431_v0  ;;  %v1804_v5 = vsel %vm1202_vm5, %v1802_v62, %v3981_v12  ;;  %v1085_v19 = vrot.slane %v1033_v51, 1 }
 0x160   : > { %v1211_v16 = vrot.slane %v1159_v33, 2  ;;  %v1447_v28 = vmul.f32 %v2914_v8, %v3088_v43  ;;  %v1570_v27 = vmul.f32 %v2919_v9, %v3208_v48  ;;  %v1373_v52 = vrot.slane %v1322_v35, 1 }
 0x161   : > { %2439 = vmatprep.mubr.msk.f32.mxu0 %vm1913_vm6, %v1890_v46  ;;  %v1593_v32 = vadd.f32 %v1577_v42, %v1556_v3  ;;  %v1609_v0 = vmul.f32 %v2931_v14, %v3324_v22  ;;  %v1734_v62 = vmul.f32 %v2944_v20, %v3324_v22  ;;  %v1086_v51 = vsel %vm1076_vm4, %v1083_v49, %v1085_v19 }
 0x162   : > { %v1212_v33 = vsel %vm1202_vm5, %v1209_v7, %v1211_v16  ;;  %v1498_v12 = vrot.slane %v1447_v28, 2  ;;  %v1002_v46 = vmul.f32 %v2862_v56, %v3011_v54  ;;  %v1136_v3 = vadd.f32 %v1086_v51, %v994_v53 }
 0x163   : > { %v1718_v42 = vadd.f32 %v1679_v47, %v1593_v32  ;;  %v1374_v35 = vsel %vm1076_vm4, %v1371_v34, %v1373_v52  ;;  %v1660_v39 = vrot.slane %v1609_v0, 1  ;;  %v1785_v49 = vrot.slane %v1734_v62, 2  ;;  %v3365_v32 = vld [vmem:[%s2884_s25 + $0xb8] sm:$0x3] }
 0x164   : > { %v1499_v2 = vsel %vm1202_vm5, %v1496_v6, %v1498_v12  ;;  %v1045_v61 = vmul.f32 %v2867_v57, %v3119_v21  ;;  %v1171_v7 = vmul.f32 %v2872_v58, %v3119_v21  ;;  %v1262_v47 = vadd.f32 %v1212_v33, %v1136_v3 }
 0x165   : > { %v1843_v28 = vadd.f32 %v1804_v5, %v1718_v42  ;;  %v1661_v18 = vsel %vm1076_vm4, %v1658_v38, %v1660_v39  ;;  %v1291_v34 = vmul.f32 %v2877_v59, %v3039_v23  ;;  %v3994_v50 = vrot.slane %v3227_v40, 2 }
 0x166   : > { %v1105_v12 = vrot.slane %v1045_v61, 1  ;;  %v1231_v53 = vrot.slane %v1171_v7, 2  ;;  %v1334_v19 = vmul.f32 %v2882_v60, %v3139_v31  ;;  %v1299_v5 = vadd.f32 %v1283_v11, %v1262_v47 }
 0x167   : > { %v1786_v6 = vsel %vm1202_vm5, %v3994_v50, %v1785_v49  ;;  %v1866_v16 = vadd.f32 %v3066_v4, %v1843_v28  ;;  %v1459_v44 = vmul.f32 %v2914_v8, %v3139_v31  ;;  %v1578_v38 = vmul.f32 %v2919_v9, %v3281_v63 }
 0x168   : > { %v3995_v40 = vrot.slane %v3238_v24, 1  ;;  %v3996_v52 = vrot.slane %v3252_v41, 2  ;;  %v1393_v62 = vrot.slane %v1334_v19, 1  ;;  %v1621_v11 = vmul.f32 %v2931_v14, %v3365_v32 }
 0x169   : > { %v1882_v51 = vmax.f32 %v1866_v16, 0.0  ;;  %v1424_v33 = vadd.f32 %v1374_v35, %v1299_v5  ;;  %v1518_v3 = vrot.slane %v1459_v44, 2  ;;  %v3997_v49 = vrot.slane %v3264_v10, 1 }
 0x16a   : > { %v1106_v39 = vsel %vm1076_vm4, %v3995_v40, %v1105_v12  ;;  %v1232_v0 = vsel %vm1202_vm5, %v3996_v52, %v1231_v53  ;;  %v1680_v7 = vrot.slane %v1621_v11, 1  ;;  %v1746_v24 = vmul.f32 %v2944_v20, %v3365_v32 }
 0x16b   : > { %v1144_v42 = vadd.f32 %v1106_v39, %v1002_v46  ;;  %v1394_v61 = vsel %vm1076_vm4, %v3997_v49, %v1393_v62  ;;  %v995_v41 = vmul.f32 %v2862_v56, %v2934_v15  ;;  %v1898_v28 = vmin.f32 %v1882_v51, 6.0 }
 0x16c   : > { %v1549_v47 = vadd.f32 %v1499_v2, %v1424_v33  ;;  %v3998_v12 = vrot.slane %v3277_v13, 2  ;;  %v3999_v46 = vrot.slane %v3293_v17, 1  ;;  %v1805_v53 = vrot.slane %v1746_v24, 2 }
 0x16d   : > { %v1270_v50 = vadd.f32 %v1232_v0, %v1144_v42  ;;  %v1034_v19 = vmul.f32 %v2867_v57, %v2934_v15  ;;  %v3396_v16 = vmul.f32 %v2867_v57, %v2953_v25  ;;  %2451 = vmatprep.mubr.msk.f32.mxu1 %vm1913_vm6, %v1898_v28  ;;  %v1160_v13 = vmul.f32 %v2872_v58, %v2934_v15 }
 0x16e   : > { %v1519_v35 = vsel %vm1202_vm5, %v3998_v12, %v1518_v3  ;;  %v1681_v10 = vsel %vm1076_vm4, %v3999_v46, %v1680_v7  ;;  %v1586_v2 = vadd.f32 %v1570_v27, %v1549_v47  ;;  %v3403_v17 = vmul.f32 %v2872_v58, %v2953_v25 }
 0x16f   : > { %v1307_v5 = vadd.f32 %v1291_v34, %v1270_v50  ;;  %v4000_v44 = vrot.slane %v3300_v55, 2  ;;  %v1087_v39 = vrot.slane %v1034_v19, 1  ;;  %v1088_v52 = vrot.slane %v3396_v16, 1 }
 0x170   : > { %v1284_v0 = vmul.f32 %v2877_v59, %v3195_v26  ;;  %v1711_v62 = vadd.f32 %v1661_v18, %v1586_v2  ;;  %v1213_v34 = vrot.slane %v1160_v13, 2  ;;  %v1214_v11 = vrot.slane %v3403_v17, 2 }
 0x171   : > { %v1806_v40 = vsel %vm1202_vm5, %v4000_v44, %v1805_v53  ;;  %v1432_v27 = vadd.f32 %v1394_v61, %v1307_v5  ;;  %v1089_v15 = vsel %vm1076_vm4, %v1087_v39, %v1088_v52  ;;  %v1323_v55 = vmul.f32 %v2882_v60, %v3195_v26 }
 0x172   : > { %v3419_v51 = vmul.f32 %v2882_v60, %v3208_v48  ;;  %v1448_v33 = vmul.f32 %v2914_v8, %v3195_v26  ;;  %v1836_v42 = vadd.f32 %v1786_v6, %v1711_v62  ;;  %v1137_v3 = vadd.f32 %v1089_v15, %v995_v41 }
 0x173   : > { %v1557_v18 = vadd.f32 %v1519_v35, %v1432_v27  ;;  %v1215_v49 = vsel %vm1202_vm5, %v1213_v34, %v1214_v11  ;;  %v1375_v61 = vrot.slane %v1323_v55, 1  ;;  %v3429_v24 = vmul.f32 %v2914_v8, %v3208_v48 }
 0x174   : > { %v1376_v7 = vrot.slane %v3419_v51, 1  ;;  %v1500_v28 = vrot.slane %v1448_v33, 2  ;;  %v1859_v47 = vadd.f32 %v3066_v4, %v1836_v42  ;;  %v1263_v12 = vadd.f32 %v1215_v49, %v1137_v3 }
 0x175   : > { %v1594_v50 = vadd.f32 %v1578_v38, %v1557_v18  ;;  %v1571_v6 = vmul.f32 %v2919_v9, %v2962_v30  ;;  %v1501_v35 = vrot.slane %v3429_v24, 2  ;;  %v1610_v46 = vmul.f32 %v2931_v14, %v2962_v30 }
 0x176   : > { %v1377_v41 = vsel %vm1076_vm4, %v1375_v61, %v1376_v7  ;;  %v3442_v53 = vmul.f32 %v2931_v14, %v2978_v36  ;;  %v1875_v19 = vmax.f32 %v1859_v47, 0.0  ;;  %v1300_v38 = vadd.f32 %v1284_v0, %v1263_v12 }
 0x177   : > { %v1719_v2 = vadd.f32 %v1681_v10, %v1594_v50  ;;  %v1735_v5 = vmul.f32 %v2944_v20, %v2962_v30  ;;  %v1502_v13 = vsel %vm1202_vm5, %v1500_v28, %v1501_v35  ;;  %v1662_v44 = vrot.slane %v1610_v46, 1 }
 0x178   : > { %v1663_v39 = vrot.slane %v3442_v53, 1  ;;  %v3452_v62 = vmul.f32 %v2944_v20, %v2978_v36  ;;  %v1891_v27 = vmin.f32 %v1875_v19, 6.0  ;;  %v1425_v15 = vadd.f32 %v1377_v41, %v1300_v38 }
 0x179   : > { %v1844_v34 = vadd.f32 %v1806_v40, %v1719_v2  ;;  %v1787_v55 = vrot.slane %v1735_v5, 2  ;;  %v1003_v33 = vmul.f32 %v2862_v56, %v3016_v1  ;;  %v1046_v42 = vmul.f32 %v2867_v57, %v3016_v1 }
 0x17a   : > { %v1664_v10 = vsel %vm1076_vm4, %v1662_v44, %v1663_v39  ;;  %v3989_v0 = vrot.slane %v3452_v62, 2  ;;  %2440 = vmatmul.mubr.msk.f32.gmra.mrb[2].mxu0 %vm1913_vm6, %v1891_v27  ;;  %v1550_v3 = vadd.f32 %v1502_v13, %v1425_v15  ;;  %v3466_v40 = vmul.f32 %v2867_v57, %v3039_v23 }
 0x17b   : > { %v1867_v18 = vadd.f32 %v3066_v4, %v1844_v34  ;;  %v1172_v49 = vmul.f32 %v2872_v58, %v3016_v1  ;;  %v1107_v28 = vrot.slane %v1046_v42, 1  ;;  %v3475_v47 = vmul.f32 %v2872_v58, %v3039_v23  ;;  %v3497_v34 = vld [vmem:[%s2884_s25 + $0xc0] sm:$0xff] }
 0x17c   : > { %v1789_v61 = vsel %vm1202_vm5, %v1787_v55, %v3989_v0  ;;  %v1292_v50 = vmul.f32 %v2877_v59, %v3269_v29  ;;  %v1587_v41 = vadd.f32 %v1571_v6, %v1550_v3  ;;  %v3986_v46 = vrot.slane %v3466_v40, 1  ;;  %v3505_v3 = vld [vmem:[%s2884_s25 + $0xc8] sm:$0xff] }
 0x17d   : > { %v1883_v12 = vmax.f32 %v1867_v18, 0.0  ;;  %v1233_v19 = vrot.slane %v1172_v49, 2  ;;  %v3984_v1 = vrot.slane %v3475_v47, 2  ;;  %v1335_v2 = vmul.f32 %v2882_v60, %v3269_v29 }
 0x17e   : > { %v3485_v38 = vmul.f32 %v2882_v60, %v3281_v63  ;;  %v1460_v5 = vmul.f32 %v2914_v8, %v3269_v29  ;;  %v1712_v44 = vadd.f32 %v1664_v10, %v1587_v41  ;;  %v1109_v6 = vsel %vm1076_vm4, %v1107_v28, %v3986_v46 }
 0x17f   : > { %v1899_v13 = vmin.f32 %v1883_v12, 6.0  ;;  %v3494_v27 = vmul.f32 %v2914_v8, %v3281_v63  ;;  %v1145_v15 = vadd.f32 %v1109_v6, %v1003_v33  ;;  %v1235_v55 = vsel %vm1202_vm5, %v1233_v19, %v3984_v1 }
 0x180   : > { %v1395_v42 = vrot.slane %v1335_v2, 1  ;;  %v3983_v18 = vrot.slane %v3485_v38, 1  ;;  %v1837_v10 = vadd.f32 %v1789_v61, %v1712_v44  ;;  %v1520_v49 = vrot.slane %v1460_v5, 2 }
 0x181   : > { %2452 = vmatmul.mubr.msk.f32.gmra.mrb[2].mxu1 %vm1913_vm6, %v1899_v13  ;;  %v3985_v28 = vrot.slane %v3494_v27, 2  ;;  %v1579_v12 = vmul.f32 %v2919_v9, %v3497_v34  ;;  %v1271_v41 = vadd.f32 %v1235_v55, %v1145_v15  ;;  %v1622_v19 = vmul.f32 %v2931_v14, %v3497_v34 }
 0x182   : > { %v1397_v33 = vsel %vm1076_vm4, %v1395_v42, %v3983_v18  ;;  %v3517_v2 = vmul.f32 %v2931_v14, %v3505_v3  ;;  %v1860_v61 = vadd.f32 %v3066_v4, %v1837_v10  ;;  %v1747_v13 = vmul.f32 %v2944_v20, %v3497_v34 }
 0x183   : > { %v1522_v5 = vsel %vm1202_vm5, %v1520_v49, %v3985_v28  ;;  %v3527_v44 = vmul.f32 %v2944_v20, %v3505_v3  ;;  %v1308_v6 = vadd.f32 %v1292_v50, %v1271_v41  ;;  %v1682_v15 = vrot.slane %v1622_v19, 1 }
 0x184   : > { %v3987_v55 = vrot.slane %v3517_v2, 1  ;;  %v996_v42 = vmul.f32 %v2862_v56, %v2953_v25  ;;  %v1876_v18 = vmax.f32 %v1860_v61, 0.0  ;;  %v1807_v10 = vrot.slane %v1747_v13, 2 }
 0x185   : > { %v3988_v1 = vrot.slane %v3527_v44, 2  ;;  %v1036_v49 = vmul.f32 %v2867_v57, %v3088_v43  ;;  %v1433_v28 = vadd.f32 %v1397_v33, %v1308_v6  ;;  %v1162_v50 = vmul.f32 %v2872_v58, %v3088_v43 }
 0x186   : > { %v1684_v46 = vsel %vm1076_vm4, %v1682_v15, %v3987_v55  ;;  %v1285_v41 = vmul.f32 %v2877_v59, %v3208_v48  ;;  %v1892_v19 = vmin.f32 %v1876_v18, 6.0  ;;  %v1325_v13 = vmul.f32 %v2882_v60, %v3324_v22 }
 0x187   : > { %v1809_v25 = vsel %vm1202_vm5, %v1807_v10, %v3988_v1  ;;  %v1090_v61 = vrot.slane %v1036_v49, 1  ;;  %v1558_v33 = vadd.f32 %v1522_v5, %v1433_v28  ;;  %v1216_v6 = vrot.slane %v1162_v50, 2 }
 0x188   : > { %v1450_v15 = vmul.f32 %v2914_v8, %v3324_v22  ;;  %v1572_v43 = vmul.f32 %v2919_v9, %v2978_v36  ;;  %2442 = vmatprep.mubr.msk.f32.mxu0 %vm1913_vm6, %v1892_v19  ;;  %v1378_v55 = vrot.slane %v1325_v13, 1  ;;  %v1612_v10 = vmul.f32 %v2931_v14, %v3103_v37 }
 0x189   : > { %v1091_v18 = vsel %vm1076_vm4, %v1088_v52, %v1090_v61  ;;  %v1737_v28 = vmul.f32 %v2944_v20, %v3103_v37  ;;  %v1595_v5 = vadd.f32 %v1579_v12, %v1558_v33  ;;  %v1217_v50 = vsel %vm1202_vm5, %v1214_v11, %v1216_v6 }
 0x18a   : > { %v1138_v49 = vadd.f32 %v1091_v18, %v996_v42  ;;  %v1503_v1 = vrot.slane %v1450_v15, 2  ;;  %v1379_v16 = vsel %vm1076_vm4, %v1376_v7, %v1378_v55  ;;  %v1665_v52 = vrot.slane %v1612_v10, 1 }
 0x18b   : > { %v1790_v19 = vrot.slane %v1737_v28, 2  ;;  %v1004_v61 = vmul.f32 %v2862_v56, %v3039_v23  ;;  %v1720_v13 = vadd.f32 %v1684_v46, %v1595_v5  ;;  %v1048_v17 = vmul.f32 %v2867_v57, %v3139_v31 }
 0x18c   : > { %v1264_v0 = vadd.f32 %v1217_v50, %v1138_v49  ;;  %v1504_v12 = vsel %vm1202_vm5, %v1501_v35, %v1503_v1  ;;  %v1666_v11 = vsel %vm1076_vm4, %v1663_v39, %v1665_v52  ;;  %v4001_v51 = vrot.slane %v3452_v62, 2  ;;  %v3583_v35 = vld [vmem:[%s2884_s25 + $0xd0] sm:$0x3] }
 0x18d   : > { %v1174_v23 = vmul.f32 %v2872_v58, %v3139_v31  ;;  %v1293_v46 = vmul.f32 %v2877_v59, %v3281_v63  ;;  %v1845_v24 = vadd.f32 %v1809_v25, %v1720_v13  ;;  %v1110_v1 = vrot.slane %v1048_v17, 1 }
 0x18e   : > { %v1791_v7 = vsel %vm1202_vm5, %v4001_v51, %v1790_v19  ;;  %v1301_v55 = vadd.f32 %v1285_v41, %v1264_v0  ;;  %v1337_v53 = vmul.f32 %v2882_v60, %v3365_v32  ;;  %v1462_v39 = vmul.f32 %v2914_v8, %v3365_v32 }
 0x18f   : > { %v1236_v42 = vrot.slane %v1174_v23, 2  ;;  %v1580_v62 = vmul.f32 %v2919_v9, %v3505_v3  ;;  %v1624_v31 = vmul.f32 %v2931_v14, %v3583_v35  ;;  %v1868_v33 = vadd.f32 %v3066_v4, %v1845_v24 }
 0x190   : > { %v1426_v25 = vadd.f32 %v1379_v16, %v1301_v55  ;;  %v4002_v0 = vrot.slane %v3466_v40, 1  ;;  %v1398_v6 = vrot.slane %v1337_v53, 1  ;;  %v4003_v18 = vrot.slane %v3475_v47, 2 }
 0x191   : > { %v1523_v28 = vrot.slane %v1462_v39, 2  ;;  %v1685_v5 = vrot.slane %v1624_v31, 1  ;;  %v1884_v49 = vmax.f32 %v1868_v33, 0.0  ;;  %v4004_v52 = vrot.slane %v3485_v38, 1 }
 0x192   : > { %v1111_v41 = vsel %vm1076_vm4, %v4002_v0, %v1110_v1  ;;  %v1237_v10 = vsel %vm1202_vm5, %v4003_v18, %v1236_v42  ;;  %v1551_v50 = vadd.f32 %v1504_v12, %v1426_v25  ;;  %v1749_v16 = vmul.f32 %v2944_v20, %v3583_v35 }
 0x193   : > { %v1146_v15 = vadd.f32 %v1111_v41, %v1004_v61  ;;  %v1399_v19 = vsel %vm1076_vm4, %v4004_v52, %v1398_v6  ;;  %v4005_v13 = vrot.slane %v3494_v27, 2  ;;  %v4006_v47 = vrot.slane %v3517_v2, 1 }
 0x194   : > { %v997_v51 = vmul.f32 %v2862_v56, %v3195_v26  ;;  %v1900_v12 = vmin.f32 %v1884_v49, 6.0  ;;  %v1588_v23 = vadd.f32 %v1572_v43, %v1551_v50  ;;  %v1810_v38 = vrot.slane %v1749_v16, 2 }
 0x195   : > { %v1272_v40 = vadd.f32 %v1237_v10, %v1146_v15  ;;  %v1524_v61 = vsel %vm1202_vm5, %v4005_v13, %v1523_v28  ;;  %v1686_v17 = vsel %vm1076_vm4, %v4006_v47, %v1685_v5  ;;  %v1037_v24 = vmul.f32 %v2867_v57, %v3195_v26 }
 0x196   : > { %v3617_v1 = vmul.f32 %v2867_v57, %v3208_v48  ;;  %v1163_v27 = vmul.f32 %v2872_v58, %v3195_v26  ;;  %v3623_v2 = vmul.f32 %v2872_v58, %v3208_v48  ;;  %2454 = vmatprep.mubr.msk.f32.mxu1 %vm1913_vm6, %v1900_v12  ;;  %v1713_v56 = vadd.f32 %v1666_v11, %v1588_v23 }
 0x197   : > { %v1309_v55 = vadd.f32 %v1293_v46, %v1272_v40  ;;  %v4007_v43 = vrot.slane %v3527_v44, 2  ;;  %v1092_v42 = vrot.slane %v1037_v24, 1  ;;  %v1286_v46 = vmul.f32 %v2877_v59, %v2962_v30 }
 0x198   : > { %v1093_v39 = vrot.slane %v3617_v1, 1  ;;  %v1218_v31 = vrot.slane %v1163_v27, 2  ;;  %v1219_v26 = vrot.slane %v3623_v2, 2  ;;  %v1838_v33 = vadd.f32 %v1791_v7, %v1713_v56 }
 0x199   : > { %v1811_v53 = vsel %vm1202_vm5, %v4007_v43, %v1810_v38  ;;  %v1434_v57 = vadd.f32 %v1399_v19, %v1309_v55  ;;  %v1326_v58 = vmul.f32 %v2882_v60, %v2962_v30  ;;  %v3637_v11 = vmul.f32 %v2882_v60, %v2978_v36  ;;  %v3702_v55 = vld [vmem:[%s3967_s3 + $0x2] ss:$0 sm:$0xff] }
 0x19a   : > { %v1451_v44 = vmul.f32 %v2914_v8, %v2962_v30  ;;  %v1094_v59 = vsel %vm1076_vm4, %v1092_v42, %v1093_v39  ;;  %v1220_v0 = vsel %vm1202_vm5, %v1218_v31, %v1219_v26  ;;  %v3649_v7 = vmul.f32 %v2914_v8, %v2978_v36 }
 0x19b   : > { %v1559_v25 = vadd.f32 %v1524_v61, %v1434_v57  ;;  %v1861_v41 = vadd.f32 %v3066_v4, %v1838_v33  ;;  %v1139_v60 = vadd.f32 %v1094_v59, %v997_v51  ;;  %v1380_v6 = vrot.slane %v1326_v58, 1  ;;  %v3678_v51 = vld [vmem:[%s3967_s3] ss:$0 sm:$0xff] }
 0x19c   : > { %v1381_v15 = vrot.slane %v3637_v11, 1  ;;  %v1505_v18 = vrot.slane %v1451_v44, 2  ;;  %v1506_v10 = vrot.slane %v3649_v7, 2  ;;  %v1573_v28 = vmul.f32 %v2919_v9, %v2990_v45 }
 0x19d   : > { %v1596_v30 = vadd.f32 %v1580_v62, %v1559_v25  ;;  %v1877_v5 = vmax.f32 %v1861_v41, 0.0  ;;  %v1265_v49 = vadd.f32 %v1220_v0, %v1139_v60  ;;  %v1613_v36 = vmul.f32 %v2931_v14, %v2990_v45  ;;  %v983_v25 = vld [vmem:[%s2884_s25 + $0xd8] sm:$0xff]  ;;  %v3729_v0 = vld [vmem:[%s3967_s3 + $0x4] ss:$0 sm:$0xff] }
 0x19e   : > { %v1382_v8 = vsel %vm1076_vm4, %v1380_v6, %v1381_v15  ;;  %v1507_v62 = vsel %vm1202_vm5, %v1505_v18, %v1506_v10  ;;  %v3666_v52 = vmul.f32 %v2931_v14, %v3011_v54  ;;  %v1738_v9 = vmul.f32 %v2944_v20, %v2990_v45 }
 0x19f   : > { %v1721_v50 = vadd.f32 %v1686_v17, %v1596_v30  ;;  %v1893_v19 = vmin.f32 %v1877_v5, 6.0  ;;  %v1302_v16 = vadd.f32 %v1286_v46, %v1265_v49  ;;  %v1667_v40 = vrot.slane %v1613_v36, 1  ;;  %v3738_v30 = vld [vmem:[%s2884_s25 + $0xe0] sm:$0xff] }
 0x1a0   : > { %v3672_v13 = vmul.f32 %v2944_v20, %v3011_v54  ;;  %v1668_v47 = vrot.slane %v3666_v52, 1  ;;  %v1792_v17 = vrot.slane %v1738_v9, 2  ;;  %v1005_v14 = vmul.f32 %v3678_v51, %v3269_v29  ;;  %v3687_v20 = vld [vmem:[%s3967_s3 + $0x1] ss:$0 sm:$0xff]  ;;  %v3746_v5 = vld [vmem:[%s3967_s3 + $0x5] ss:$0 sm:$0xff] }
 0x1a1   : > { %v1846_v61 = vadd.f32 %v1811_v53, %v1721_v50  ;;  %2443 = vmatmul.mubr.msk.f32.gmra.mrb[4].mxu0 %vm1913_vm6, %v1893_v19  ;;  %v1427_v45 = vadd.f32 %v1382_v8, %v1302_v16  ;;  %v1049_v54 = vmul.f32 %v3687_v20, %v3269_v29  ;;  %v3693_v23 = vmul.f32 %v3687_v20, %v3281_v63  ;;  %v3759_v16 = vld [vmem:[%s3967_s3 + $0x7] ss:$0 sm:$0xff] }
 0x1a2   : > { %v1793_v12 = vrot.slane %v3672_v13, 2  ;;  %v1669_v24 = vsel %vm1076_vm4, %v1667_v40, %v1668_v47  ;;  %v1175_v27 = vmul.f32 %v3702_v55, %v3269_v29  ;;  %v3708_v56 = vmul.f32 %v3702_v55, %v3281_v63  ;;  %v3718_v29 = vld [vmem:[%s3967_s3 + $0x3] ss:$0 sm:$0xff] }
 0x1a3   : > { %v1869_v38 = vadd.f32 %v3066_v4, %v1846_v61  ;;  %v1552_v43 = vadd.f32 %v1507_v62, %v1427_v45  ;;  %v1112_v42 = vrot.slane %v1049_v54, 1  ;;  %v1113_v46 = vrot.slane %v3693_v23, 1  ;;  %v3773_v54 = vld [vmem:[%s3967_s3 + $0x8] ss:$0 sm:$0xff] }
 0x1a4   : > { %v1794_v53 = vsel %vm1202_vm5, %v1792_v17, %v1793_v12  ;;  %v1238_v31 = vrot.slane %v1175_v27, 2  ;;  %v1239_v33 = vrot.slane %v3708_v56, 2  ;;  %v1294_v58 = vmul.f32 %v3718_v29, %v3497_v34 }
 0x1a5   : > { %v1885_v57 = vmax.f32 %v1869_v38, 0.0  ;;  %v1589_v44 = vadd.f32 %v1573_v28, %v1552_v43  ;;  %v1114_v59 = vsel %vm1076_vm4, %v1112_v42, %v1113_v46  ;;  %v1338_v41 = vmul.f32 %v3729_v0, %v3497_v34 }
 0x1a6   : > { %v3735_v60 = vmul.f32 %v3729_v0, %v3505_v3  ;;  %v1147_v18 = vadd.f32 %v1114_v59, %v1005_v14  ;;  %v1240_v28 = vsel %vm1202_vm5, %v1238_v31, %v1239_v33  ;;  %v1463_v49 = vmul.f32 %v3746_v5, %v3497_v34  ;;  %v3788_v31 = vld [vmem:[%s3967_s3 + $0x6] ss:$0 sm:$0xff] }
 0x1a7   : > { %v1901_v6 = vmin.f32 %v1885_v57, 6.0  ;;  %v1714_v8 = vadd.f32 %v1669_v24, %v1589_v44  ;;  %v1400_v36 = vrot.slane %v1338_v41, 1  ;;  %v3753_v62 = vmul.f32 %v3746_v5, %v3505_v3 }
 0x1a8   : > { %v1401_v50 = vrot.slane %v3735_v60, 1  ;;  %v1273_v9 = vadd.f32 %v1240_v28, %v1147_v18  ;;  %v1525_v19 = vrot.slane %v1463_v49, 2  ;;  %v1625_v40 = vmul.f32 %v3759_v16, %v983_v25 }
 0x1a9   : > { %2455 = vmatmul.mubr.msk.f32.gmra.mrb[4].mxu1 %vm1913_vm6, %v1901_v6  ;;  %v1839_v34 = vadd.f32 %v1794_v53, %v1714_v8  ;;  %v1526_v17 = vrot.slane %v3753_v62, 2  ;;  %v3768_v14 = vmul.f32 %v3759_v16, %v3738_v30  ;;  %v1750_v38 = vmul.f32 %v3773_v54, %v983_v25 }
 0x1aa   : > { %v1402_v61 = vsel %vm1076_vm4, %v1400_v36, %v1401_v50  ;;  %v1310_v45 = vadd.f32 %v1294_v58, %v1273_v9  ;;  %v3778_v24 = vmul.f32 %v3773_v54, %v3738_v30  ;;  %v1687_v53 = vrot.slane %v1625_v40, 1  ;;  %v2518_v40 = vld [vmem:[%s2884_s25 + $0x68] sm:$0xff] }
 0x1ab   : > { %v1862_v27 = vadd.f32 %v3066_v4, %v1839_v34  ;;  %v1527_v43 = vsel %vm1202_vm5, %v1525_v19, %v1526_v17  ;;  %v1688_v42 = vrot.slane %v3768_v14, 1  ;;  %v1581_v58 = vmul.f32 %v3788_v31, %v983_v25  ;;  %v3883_v14 = vld [vmem:[%s3970_s6] ss:$0 sm:$0xff] }
 0x1ac   : > { %v1435_v57 = vadd.f32 %v1402_v61, %v1310_v45  ;;  %v998_v44 = vmul.f32 %v3678_v51, %v3208_v48  ;;  %v1039_v4 = vmul.f32 %v3687_v20, %v3324_v22  ;;  %v1812_v41 = vrot.slane %v1750_v38, 2 }
 0x1ad   : > { %v1878_v59 = vmax.f32 %v1862_v27, 0.0  ;;  %v1813_v6 = vrot.slane %v3778_v24, 2  ;;  %v1165_v18 = vmul.f32 %v3702_v55, %v3324_v22  ;;  %v1328_v8 = vmul.f32 %v3729_v0, %v3103_v37 }
 0x1ae   : > { %v1560_v28 = vadd.f32 %v1527_v43, %v1435_v57  ;;  %v1095_v49 = vrot.slane %v1039_v4, 1  ;;  %v1689_v48 = vsel %vm1076_vm4, %v1687_v53, %v1688_v42  ;;  %v1453_v9 = vmul.f32 %v3746_v5, %v3103_v37  ;;  %v2519_v53 = vld [vmem:[%s2884_s25 + $0x80] sm:$0xff] }
 0x1af   : > { %v1894_v25 = vmin.f32 %v1878_v59, 6.0  ;;  %v1221_v36 = vrot.slane %v1165_v18, 2  ;;  %v1287_v34 = vmul.f32 %v2518_v40, %v3718_v29  ;;  %v1383_v61 = vrot.slane %v1328_v8, 1 }
 0x1b0   : > { %v1597_v19 = vadd.f32 %v1581_v58, %v1560_v28  ;;  %v1096_v22 = vsel %vm1076_vm4, %v1093_v39, %v1095_v49  ;;  %v1814_v45 = vsel %vm1202_vm5, %v1812_v41, %v1813_v6  ;;  %v1615_v1 = vmul.f32 %v3759_v16, %v3119_v21 }
 0x1b1   : > { %2445 = vmatprep.mubr.msk.f32.mxu0 %vm1913_vm6, %v1894_v25  ;;  %v1140_v38 = vadd.f32 %v1096_v22, %v998_v44  ;;  %v1222_v37 = vsel %vm1202_vm5, %v1219_v26, %v1221_v36  ;;  %v1508_v39 = vrot.slane %v1453_v9, 2  ;;  %v1574_v57 = vmul.f32 %v2519_v53, %v3788_v31 }
 0x1b2   : > { %v1722_v27 = vadd.f32 %v1689_v48, %v1597_v19  ;;  %v1740_v58 = vmul.f32 %v3773_v54, %v3119_v21  ;;  %v1051_v44 = vmul.f32 %v3687_v20, %v3365_v32  ;;  %v1384_v2 = vsel %vm1076_vm4, %v1381_v15, %v1383_v61  ;;  %v2520_v20 = vld [vmem:[%s3968_s4] ss:$0 sm:$0xff]  ;;  %v985_v15 = vld [vmem:[%s2884_s25 + $0xe8] sm:$0x3]  ;;  %s2330_s25 = sshll.u32 %s2543_s24, 7 }
 0x1b3   : > { %v1266_v43 = vadd.f32 %v1222_v37, %v1140_v38  ;;  %v1006_v26 = vmul.f32 %v3678_v51, %v3281_v63  ;;  %v1177_v59 = vmul.f32 %v3702_v55, %v3365_v32  ;;  %v1670_v18 = vrot.slane %v1615_v1, 1  ;;  %s3878_s10 = scalar_lea.vmem %s2638_s13, %s2330_s25 }
 0x1b4   : > { %v1847_v4 = vadd.f32 %v1814_v45, %v1722_v27  ;;  %v1115_v28 = vrot.slane %v1051_v44, 1  ;;  %v1340_v21 = vmul.f32 %v3729_v0, %v3583_v35  ;;  %v1509_v11 = vsel %vm1202_vm5, %v1506_v10, %v1508_v39  ;;  %v2109_v27 = vld [vmem:[%s3878_s10] sm:$0xff] }
 0x1b5   : > { %v1303_v41 = vadd.f32 %v1287_v34, %v1266_v43  ;;  %v1241_v63 = vrot.slane %v1177_v59, 2  ;;  %v1465_v32 = vmul.f32 %v3746_v5, %v3583_v35  ;;  %v1795_v55 = vrot.slane %v1740_v58, 2  ;;  %v2118_v58 = vld [vmem:[%s3878_s10 + $0x48] sm:$0xff] }
 0x1b6   : > { %v1870_v49 = vadd.f32 %v2520_v20, %v1847_v4  ;;  %v1116_v0 = vsel %vm1076_vm4, %v1113_v46, %v1115_v28  ;;  %v1403_v8 = vrot.slane %v1340_v21, 1  ;;  %v1295_v10 = vmul.f32 %v3718_v29, %v3505_v3  ;;  %v2112_v28 = vld [vmem:[%s3878_s10 + $0x18] sm:$0xff] }
 0x1b7   : > { %v1428_v51 = vadd.f32 %v1384_v2, %v1303_v41  ;;  %v1148_v48 = vadd.f32 %v1116_v0, %v1006_v26  ;;  %v1242_v7 = vsel %vm1202_vm5, %v1239_v33, %v1241_v63  ;;  %v1528_v9 = vrot.slane %v1465_v32, 2  ;;  %v2117_v2 = vld [vmem:[%s3878_s10 + $0x40] sm:$0xff] }
 0x1b8   : > { %v1886_v25 = vmax.f32 %v1870_v49, 0.0  ;;  %v1627_v35 = vmul.f32 %v3759_v16, %v985_v15  ;;  %v1671_v23 = vsel %vm1076_vm4, %v1668_v47, %v1670_v18  ;;  %v1404_v56 = vsel %vm1076_vm4, %v1401_v50, %v1403_v8  ;;  %v2111_v49 = vld [vmem:[%s3878_s10 + $0x10] sm:$0xff] }
 0x1b9   : > { %v1553_v36 = vadd.f32 %v1509_v11, %v1428_v51  ;;  %v1274_v46 = vadd.f32 %v1242_v7, %v1148_v48  ;;  %v1752_v33 = vmul.f32 %v3773_v54, %v985_v15  ;;  %v1796_v3 = vsel %vm1202_vm5, %v1793_v12, %v1795_v55  ;;  %v2120_v51 = vld [vmem:[%s3878_s10 + $0x58] sm:$0xff]  ;;  %v2119_v8 = vld [vmem:[%s3878_s10 + $0x50] sm:$0xff] }
 0x1ba   : > { %v1902_v5 = vmin.f32 %v1886_v25, 6.0  ;;  %v1529_v52 = vsel %vm1202_vm5, %v1526_v17, %v1528_v9  ;;  %v1690_v47 = vrot.slane %v1627_v35, 1  ;;  %v1582_v60 = vmul.f32 %v3788_v31, %v3738_v30 }
 0x1bb   : > { %v1590_v19 = vadd.f32 %v1574_v57, %v1553_v36  ;;  %v1311_v29 = vadd.f32 %v1295_v10, %v1274_v46  ;;  %v1815_v54 = vrot.slane %v1752_v33, 2  ;;  %v2114_v36 = vld [vmem:[%s3878_s10 + $0x28] sm:$0xff] }
 0x1bc   : > { %2457 = vmatprep.mubr.msk.f32.mxu1 %vm1913_vm6, %v1902_v5  ;;  %v1691_v13 = vsel %vm1076_vm4, %v1688_v42, %v1690_v47  ;;  %v2110_v42 = vld [vmem:[%s3878_s10 + $0x8] sm:$0xff]  ;;  %v2113_v5 = vld [vmem:[%s3878_s10 + $0x20] sm:$0xff] }
 0x1bd   : > { %v1715_v16 = vadd.f32 %v1671_v23, %v1590_v19  ;;  %v1436_v22 = vadd.f32 %v1404_v56, %v1311_v29  ;;  %v1816_v62 = vsel %vm1202_vm5, %v1813_v6, %v1815_v54  ;;  %v2122_v33 = vld [vmem:[%s3878_s10 + $0x68] sm:$0xff] }
 0x1bf   : > { %v1840_v50 = vadd.f32 %v1796_v3, %v1715_v16  ;;  %v1561_v40 = vadd.f32 %v1529_v52, %v1436_v22  ;;  %v2121_v16 = vld [vmem:[%s3878_s10 + $0x60] sm:$0xff] }
 0x1c1   : > { %v1863_v34 = vadd.f32 %v2520_v20, %v1840_v50  ;;  %v1598_v12 = vadd.f32 %v1582_v60, %v1561_v40  ;;  %v2116_v50 = vld [vmem:[%s3878_s10 + $0x38] sm:$0xff] }
 0x1c3   : > { %v1879_v61 = vmax.f32 %v1863_v34, 0.0  ;;  %v1723_v17 = vadd.f32 %v1691_v13, %v1598_v12  ;;  %v2115_v34 = vld [vmem:[%s3878_s10 + $0x30] sm:$0xff] }
 0x1c5   : > { %v1895_v45 = vmin.f32 %v1879_v61, 6.0  ;;  %v1848_v38 = vadd.f32 %v1816_v62, %v1723_v17  ;;  %v2124_v17 = vld [vmem:[%s3878_s10 + $0x78] sm:$0xff] }
 0x1c7   : > { %2446 = vmatmul.mubr.msk.f32.gmra.mrb[6].mxu0 %vm1913_vm6, %v1895_v45  ;;  %v1871_v30 = vadd.f32 %v2520_v20, %v1848_v38 }
 0x1c9   : > { %v1887_v31 = vmax.f32 %v1871_v30, 0.0  ;;  %v2123_v30 = vld [vmem:[%s3878_s10 + $0x70] sm:$0xff] }
 0x1cb   : > { %v1903_v37 = vmin.f32 %v1887_v31, 6.0 }
 0x1cd   : > { %2458 = vmatmul.mubr.msk.f32.gmra.mrb[6].mxu1 %vm1913_vm6, %v1903_v37 }
 0x224   : > { %v2438_v24 = vpop.f32.mrb[0].mxu0 }
 0x225   : > { %v2034_v6 = vadd.f32 %v2438_v24, %v3883_v14  ;;  %v2028_v1 = vpop.f32.mrb[1].mxu0 }
 0x226   : > { %v2029_v39 = vadd.f32 %v3883_v14, %v2028_v1 }
 0x227   : > { %v2126_v43 = vadd.f32 %v2110_v42, %v2034_v6 }
 0x228   : > { %v2125_v53 = vadd.f32 %v2109_v27, %v2029_v39 }
 0x229   : > { %2143 = vst.msk [vmem:[%s2643_s19 + $0x8] sm:$0xff] %vm2141_vm7, %v2126_v43 }
 0x22a   : > { %2142 = vst.msk [vmem:[%s2643_s19] sm:$0xff] %vm2141_vm7, %v2125_v53 }
 0x22b   : > { %v2450_v57 = vpop.f32.mrb[0].mxu1 }
 0x22c   : > { %v2074_v44 = vadd.f32 %v2450_v57, %v3883_v14  ;;  %v2068_v4 = vpop.f32.mrb[1].mxu1 }
 0x22d   : > { %v2069_v26 = vadd.f32 %v3883_v14, %v2068_v4 }
 0x22e   : > { %v2134_v59 = vadd.f32 %v2118_v58, %v2074_v44 }
 0x22f   : > { %v2133_v41 = vadd.f32 %v2117_v2, %v2069_v26 }
 0x230   : > { %2151 = vst.msk [vmem:[%s2643_s19 + $0x48] sm:$0xff] %vm2141_vm7, %v2134_v59 }
 0x231   : > { %2150 = vst.msk [vmem:[%s2643_s19 + $0x40] sm:$0xff] %vm2141_vm7, %v2133_v41 }
 0x24d   : > { %v2441_v18 = vpop.f32.mrb[2].mxu0 }
 0x24e   : > { %v2044_v21 = vadd.f32 %v2441_v18, %v3883_v14  ;;  %v2038_v20 = vpop.f32.mrb[3].mxu0 }
 0x24f   : > { %v2039_v11 = vadd.f32 %v3883_v14, %v2038_v20 }
 0x250   : > { %v2128_v15 = vadd.f32 %v2112_v28, %v2044_v21 }
 0x251   : > { %v2127_v63 = vadd.f32 %v2111_v49, %v2039_v11 }
 0x252   : > { %2145 = vst.msk [vmem:[%s2643_s19 + $0x18] sm:$0xff] %vm2141_vm7, %v2128_v15 }
 0x253   : > { %2144 = vst.msk [vmem:[%s2643_s19 + $0x10] sm:$0xff] %vm2141_vm7, %v2127_v63 }
 0x254   : > { %v2453_v32 = vpop.f32.mrb[2].mxu1 }
 0x255   : > { %v2084_v55 = vadd.f32 %v2453_v32, %v3883_v14  ;;  %v2078_v0 = vpop.f32.mrb[3].mxu1 }
 0x256   : > { %v2079_v25 = vadd.f32 %v3883_v14, %v2078_v0 }
 0x257   : > { %v2136_v48 = vadd.f32 %v2120_v51, %v2084_v55 }
 0x258   : > { %v2135_v7 = vadd.f32 %v2119_v8, %v2079_v25 }
 0x259   : > { %2153 = vst.msk [vmem:[%s2643_s19 + $0x58] sm:$0xff] %vm2141_vm7, %v2136_v48 }
 0x25a   : > { %2152 = vst.msk [vmem:[%s2643_s19 + $0x50] sm:$0xff] %vm2141_vm7, %v2135_v7 }
 0x274   : > { %v2444_v10 = vpop.f32.mrb[4].mxu0 }
 0x275   : > { %v2054_v9 = vadd.f32 %v2444_v10, %v3883_v14  ;;  %v2048_v35 = vpop.f32.mrb[5].mxu0 }
 0x276   : > { %v2049_v23 = vadd.f32 %v3883_v14, %v2048_v35 }
 0x277   : > { %v2130_v46 = vadd.f32 %v2114_v36, %v2054_v9 }
 0x278   : > { %v2129_v19 = vadd.f32 %v2113_v5, %v2049_v23 }
 0x279   : > { %2147 = vst.msk [vmem:[%s2643_s19 + $0x28] sm:$0xff] %vm2141_vm7, %v2130_v46 }
 0x27a   : > { %2146 = vst.msk [vmem:[%s2643_s19 + $0x20] sm:$0xff] %vm2141_vm7, %v2129_v19 }
 0x27c   : > { %v2456_v56 = vpop.f32.mrb[4].mxu1 }
 0x27d   : > { %v2094_v3 = vadd.f32 %v2456_v56, %v3883_v14  ;;  %v2088_v29 = vpop.f32.mrb[5].mxu1 }
 0x27e   : > { %v2089_v52 = vadd.f32 %v3883_v14, %v2088_v29 }
 0x27f   : > { %v2138_v47 = vadd.f32 %v2122_v33, %v2094_v3 }
 0x280   : > { %v2137_v22 = vadd.f32 %v2121_v16, %v2089_v52 }
 0x281   : > { %2155 = vst.msk [vmem:[%s2643_s19 + $0x68] sm:$0xff] %vm2141_vm7, %v2138_v47 }
 0x282   : > { %2154 = vst.msk [vmem:[%s2643_s19 + $0x60] sm:$0xff] %vm2141_vm7, %v2137_v22 }
 0x29a   : > { %v2447_v60 = vpop.f32.mrb[6].mxu0 }
 0x29b   : > { %v2064_v54 = vadd.f32 %v2447_v60, %v3883_v14  ;;  %v2058_v40 = vpop.f32.mrb[7].mxu0 }
 0x29c   : > { %v2059_v13 = vadd.f32 %v3883_v14, %v2058_v40 }
 0x29d   : > { %v2132_v12 = vadd.f32 %v2116_v50, %v2064_v54 }
 0x29e   : > { %v2131_v61 = vadd.f32 %v2115_v34, %v2059_v13 }
 0x29f   : > { %2149 = vst.msk [vmem:[%s2643_s19 + $0x38] sm:$0xff] %vm2141_vm7, %v2132_v12 }
 0x2a0   : > { %2148 = vst.msk [vmem:[%s2643_s19 + $0x30] sm:$0xff] %vm2141_vm7, %v2131_v61  ;;  %v2459_v62 = vpop.f32.mrb[6].mxu1 }
 0x2a1   : > { %v2104_v45 = vadd.f32 %v2459_v62, %v3883_v14  ;;  %v2098_v38 = vpop.f32.mrb[7].mxu1 }
 0x2a2   : > { %v2099_v31 = vadd.f32 %v3883_v14, %v2098_v38 }
 0x2a3   : > { %v2140_v37 = vadd.f32 %v2124_v17, %v2104_v45 }
 0x2a4   : > { %v2139_v24 = vadd.f32 %v2123_v30, %v2099_v31 }
 0x2a5   : > { %2157 = vst.msk [vmem:[%s2643_s19 + $0x78] sm:$0xff] %vm2141_vm7, %v2140_v37 }
 0x2a6   : > { %2156 = vst.msk [vmem:[%s2643_s19 + $0x70] sm:$0xff] %vm2141_vm7, %v2139_v24 }
 0x2a7 PF: > { %s17_s28 = sadd.s32 1, %s2559_s28   ;;  %s4008_s24 = smov %s2551_s26 }
 0x2a8   : > { %p14_p8 = scmp.ge.s32.totalorder %s17_s28, 6   ;;  %s4009_s25 = smov %s2555_s27 }
 0x2a9   : > { %s4010_s26 = smov %s4013_s29  ;;  %s4011_s27 = smov %s4017_s30 }
 0x2aa   :  { %16 = sbr.rel (!%p14_p8) target bundleno = 3 (0x3), region = 86 }

</bundles_post_ra>
